<compile_context>
chip_gen: v5e
topology: v5e:2x2
jax: 0.10.0
libtpu: 0.0.40
codegen_flags: <defaults>
</compile_context>

<pallas_src>
from functools import partial

import jax
import jax.numpy as jnp
from jax.experimental import pallas as pl
from jax.experimental.pallas import tpu as pltpu


# ------------------------------ fused kernel --------------------------------

def _encoder_kernel(emb_ref, maskb_ref, eg_ref, eb_ref,
                    wqkv_ref, bqkv_ref, wo_ref, bo_ref,
                    ln1g_ref, ln1b_ref, wi_ref, bi_ref, wp_ref, bp_ref,
                    ln2g_ref, ln2b_ref, clsw_ref, clsb_ref,
                    preds_ref, h_scr, ctx_scr,
                    *, num_heads, eps):
    """One grid step = (batch-tile bt, encoder layer l) on VMEM-resident tiles."""
    l = pl.program_id(1)
    n_layers = pl.num_programs(1)

    TB, S, D = emb_ref.shape                     # block shape (static)
    M = TB * S
    H = num_heads
    dh = D // H
    scale = 1.0 / float(dh) ** 0.5

    def ln(x, g, b):
        mu = jnp.mean(x, axis=-1, keepdims=True)
        var = jnp.mean(jnp.square(x - mu), axis=-1, keepdims=True)
        return (x - mu) * jax.lax.rsqrt(var + eps) * g + b

    # ---- layer 0: initialize resident hidden state = LN(embeddings) ----
    @pl.when(l == 0)
    def _():
        x = emb_ref[...].reshape(M, D).astype(jnp.float32)      # (M, D)
        h_scr[...] = ln(x, eg_ref[...], eb_ref[...])

    h = h_scr[...]                                              # (M, D) f32

    # ---- fused QKV projection: one MXU matmul with M = TB*S rows ----
    qkv = jnp.dot(h.astype(jnp.bfloat16), wqkv_ref[0],
                  preferred_element_type=jnp.float32) + bqkv_ref[0]   # (M, 3D)

    # cast once, pre-scale q once (no per-head casts / per-head S*S scaling)
    q = (qkv[:, :D] * scale).astype(jnp.bfloat16).reshape(TB, S, D)
    k = qkv[:, D:2 * D].astype(jnp.bfloat16).reshape(TB, S, D)
    v = qkv[:, 2 * D:].astype(jnp.bfloat16).reshape(TB, S, D)

    # hoisted additive attention-mask bias (broadcast done once, not per head)
    bias = jnp.broadcast_to(maskb_ref[...], (TB, S, S))          # (TB, S, S) f32

    # ---- multi-head self-attention, batched over the batch tile ----
    for hh in range(H):                                          # short static loop
        sl = slice(hh * dh, (hh + 1) * dh)
        s = jnp.einsum('bqd,bkd->bqk', q[:, :, sl], k[:, :, sl],
                       preferred_element_type=jnp.float32) + bias     # (TB,S,S)
        m = jnp.max(s, axis=-1, keepdims=True)
        p = jnp.exp(s - m)
        p = p * pl.reciprocal(jnp.sum(p, axis=-1, keepdims=True), approx=True)
        ctx_h = jnp.einsum('bqk,bkd->bqd', p.astype(jnp.bfloat16), v[:, :, sl],
                           preferred_element_type=jnp.float32)        # (TB,S,dh)
        # heads are contiguous lane slices -> no transpose needed
        ctx_scr[:, :, sl] = ctx_h.astype(jnp.bfloat16)

    # ---- single K=D output projection (full MXU contraction) ----
    attn = jnp.dot(ctx_scr[...].reshape(M, D), wo_ref[0],
                   preferred_element_type=jnp.float32) + bo_ref[0]    # (M, D)

    # ---- residual + LN (epilogue-fused) ----
    h1 = ln(h + attn, ln1g_ref[0], ln1b_ref[0])

    # ---- FFN: dense+GELU, dense, residual + LN (all in-VMEM) ----
    # TODO(synk): HF BERT uses exact erf-GELU; tanh approximation kept for TPU lowering.
    ffn = jnp.dot(h1.astype(jnp.bfloat16), wi_ref[0],
                  preferred_element_type=jnp.float32) + bi_ref[0]     # (M, I)
    ffn = jax.nn.gelu(ffn, approximate=True)
    ffn = jnp.dot(ffn.astype(jnp.bfloat16), wp_ref[0],
                  preferred_element_type=jnp.float32) + bp_ref[0]     # (M, D)
    h2 = ln(h1 + ffn, ln2g_ref[0], ln2b_ref[0])
    h_scr[...] = h2

    # ---- last layer: fused classifier + argmax (logits never leave VMEM) ----
    @pl.when(l == n_layers - 1)
    def _():
        logits = jnp.dot(h2.astype(jnp.bfloat16), clsw_ref[...],
                         preferred_element_type=jnp.float32) + clsb_ref[...]  # (M, Cpad)
        mx = jnp.max(logits, axis=-1, keepdims=True)
        ids = jax.lax.broadcasted_iota(jnp.int32, logits.shape, 1)
        idx = jnp.min(jnp.where(logits == mx, ids, jnp.int32(2 ** 30)),
                      axis=-1, keepdims=True)                    # (M, 1) int32
        preds_ref[...] = idx.reshape(TB, S, 1)


def _vmem_limit_bytes():
    # ~100 MiB on 128-MiB parts (v5e/v6e), ~56 MiB on 64-MiB parts (v7x).
    try:
        cap = int(pltpu.get_tpu_info().vmem_capacity_bytes)
    except Exception:
        cap = 64 * 1024 * 1024
    return max(32 * 1024 * 1024, min(cap - 8 * 1024 * 1024, 100 * 1024 * 1024))


def _encoder_call(emb, mask_bias, p, *, num_heads, batch_tile=None):
    B, S, D = emb.shape
    L = p["wqkv"].shape[0]
    I = p["wi"].shape[-1]
    Cpad = p["cls_w"].shape[-1]

    # batch tile: weights are streamed once per tile -> make it as big as fits.
    tb = B if batch_tile is None else min(batch_tile, B)
    while B % tb:
        tb -= 1
    n_tiles = B // tb

    def b_only(shape):   # per-batch-tile blocks (constant over the layer axis)
        return pl.BlockSpec(shape, lambda bt, l: (bt,) + (0,) * (len(shape) - 1))

    def l_only(shape):   # per-layer weight blocks (prefetched layer by layer)
        return pl.BlockSpec(shape, lambda bt, l: (l,) + (0,) * (len(shape) - 1))

    def fixed(shape):    # shared parameters
        return pl.BlockSpec(shape, lambda bt, l: (0,) * len(shape))

    grid_spec = pltpu.PrefetchScalarGridSpec(
        num_scalar_prefetch=0,
        grid=(n_tiles, L),            # batch-tile outer (parallel), layer inner
        in_specs=[
            b_only((tb, S, D)),       # emb sum (tok + pos + type)
            b_only((tb, 1, S)),       # additive attention-mask bias
            fixed((1, D)),            # emb LN gamma
            fixed((1, D)),            # emb LN beta
            l_only((1, D, 3 * D)),    # fused Wqkv
            l_only((1, 1, 3 * D)),    # fused bqkv
            l_only((1, D, D)),        # Wo
            l_only((1, 1, D)),        # bo
            l_only((1, 1, D)),        # ln1 gamma
            l_only((1, 1, D)),        # ln1 beta
            l_only((1, D, I)),        # Wi
            l_only((1, 1, I)),        # bi
            l_only((1, I, D)),        # Wp
            l_only((1, 1, D)),        # bp
            l_only((1, 1, D)),        # ln2 gamma
            l_only((1, 1, D)),        # ln2 beta
            fixed((D, Cpad)),         # classifier W (lane-padded to 128)
            fixed((1, Cpad)),         # classifier b (padded cols = -1e30)
        ],
        out_specs=pl.BlockSpec((tb, S, 1), lambda bt, l: (bt, 0, 0)),
        scratch_shapes=[
            pltpu.VMEM((tb * S, D), jnp.float32),   # resident hidden state
            pltpu.VMEM((tb, S, D), jnp.bfloat16),   # per-head ctx staging for Wo
        ],
    )

    # advisory cost hint so XLA schedules embedding gathers around the fused call
    flops = 2 * B * S * L * (3 * D * D + 2 * S * D + D * D + 2 * D * I) \
        + 2 * B * S * D * Cpad
    trans = B * L * (num_heads * S * S + S * I)
    w_bytes = 2 * L * (3 * D * D + D * D + 2 * D * I)          # bf16 layer weights
    bytes_accessed = n_tiles * w_bytes + B * S * D * 4 + B * S * 4 + 2 * D * Cpad

    return pl.pallas_call(
        partial(_encoder_kernel, num_heads=num_heads, eps=1e-12),
        out_shape=jax.ShapeDtypeStruct((B, S, 1), jnp.int32),
        grid_spec=grid_spec,
        compiler_params=pltpu.CompilerParams(
            dimension_semantics=("parallel", "arbitrary"),
            vmem_limit_bytes=_vmem_limit_bytes(),
        ),
        cost_estimate=pl.CostEstimate(flops=flops, transcendentals=trans,
                                      bytes_accessed=bytes_accessed),
    )(emb, mask_bias,
      p["emb_ln_g"], p["emb_ln_b"],
      p["wqkv"], p["bqkv"], p["wo"], p["bo"], p["ln1_g"], p["ln1_b"],
      p["wi"], p["bi"], p["wp"], p["bp"], p["ln2_g"], p["ln2_b"],
      p["cls_w"], p["cls_b"])


# --------------------------- parameter init (glue) --------------------------

def init_params(key, *, vocab, max_pos, D, H, I, L, C):
    del H
    ks = jax.random.split(key, 8)
    std = 0.02

    def rnd(k, shape):
        return jax.random.normal(k, shape, jnp.float32) * std

    # classifier padded to a full 128-lane tile; padded columns can never win
    # the argmax because their bias is -1e30.
    c_pad = ((C + 127) // 128) * 128
    cls_w = jnp.zeros((D, c_pad), jnp.float32).at[:, :C].set(rnd(ks[7], (D, C)))
    cls_b = jnp.full((1, c_pad), -1e30, jnp.float32).at[:, :C].set(0.0)

    return {
        "word_emb": rnd(ks[0], (vocab, D)),
        "pos_emb": rnd(ks[1], (max_pos, D)),
        "type_emb": rnd(ks[2], (2, D)),
        "emb_ln_g": jnp.ones((1, D), jnp.float32),
        "emb_ln_b": jnp.zeros((1, D), jnp.float32),
        # per-layer weights stacked on a leading layer axis (grid-over-layers),
        # matmul weights stored bf16 (f32 accumulation inside the kernel).
        "wqkv": rnd(ks[3], (L, D, 3 * D)).astype(jnp.bfloat16),
        "bqkv": jnp.zeros((L, 1, 3 * D), jnp.float32),
        "wo": rnd(ks[4], (L, D, D)).astype(jnp.bfloat16),
        "bo": jnp.zeros((L, 1, D), jnp.float32),
        "ln1_g": jnp.ones((L, 1, D), jnp.float32),
        "ln1_b": jnp.zeros((L, 1, D), jnp.float32),
        "wi": rnd(ks[5], (L, D, I)).astype(jnp.bfloat16),
        "bi": jnp.zeros((L, 1, I), jnp.float32),
        "wp": rnd(ks[6], (L, I, D)).astype(jnp.bfloat16),
        "bp": jnp.zeros((L, 1, D), jnp.float32),
        "ln2_g": jnp.ones((L, 1, D), jnp.float32),
        "ln2_b": jnp.zeros((L, 1, D), jnp.float32),
        "cls_w": cls_w.astype(jnp.bfloat16),
        "cls_b": cls_b,
    }


# ------------------------------- forward pass --------------------------------

def bert_crf_forward(params, sentence, mask, label=None, *, num_heads,
                     batch_tile=None):
    # mirrors Bert_CRF.forward with use_lstm=False, use_crf=False, label=None
    del label
    B, S = sentence.shape

    # embeddings (gathers are plain-JAX glue feeding the fused kernel)
    tok = params["word_emb"][sentence]                 # (B, S, D)
    pos = params["pos_emb"][:S][None, :, :]            # (1, S, D)
    typ = params["type_emb"][0][None, None, :]         # (1, 1, D)
    emb = (tok + pos + typ).astype(jnp.float32)        # (B, S, D)

    # additive attention-mask bias. The reference calls self.bert(sentence)
    # with no attention_mask; an all-ones mask yields a zero bias (identical).
    mask_bias = ((1.0 - mask.astype(jnp.float32)) * -1e9).reshape(B, 1, S)

    preds = _encoder_call(emb, mask_bias, params, num_heads=num_heads,
                          batch_tile=batch_tile)
    # Dropout(p=0.1) is the eval-mode identity; argmax done inside the kernel.
    # TODO(synk): CRF decode / CrossEntropyLoss / LSTM branches (use_crf /
    #             use_lstm / label != None) are not exercised by the default flags.
    return preds.reshape(B, S)


# ----------------------------------- main ------------------------------------

if __name__ == "__main__":
    B, S = 2, 8
    VOCAB, MAX_POS = 100, 64
    D, H, I, L = 32, 2, 64, 2
    N_CLASSES = 5

    key = jax.random.PRNGKey(0)
    k_param, k_tok = jax.random.split(key)
    params = init_params(k_param, vocab=VOCAB, max_pos=MAX_POS,
                         D=D, H=H, I=I, L=L, C=N_CLASSES)

    sentence = jax.random.randint(k_tok, (B, S), 0, VOCAB, dtype=jnp.int32)
    mask = jnp.ones((B, S), dtype=jnp.bool_)

    preds = bert_crf_forward(params, sentence, mask, label=None, num_heads=H)
    preds = jax.block_until_ready(preds)
    assert preds.shape == (B, S) and preds.dtype == jnp.int32
    assert bool(jnp.all((preds >= 0) & (preds < N_CLASSES)))
    print("KERNEL_OK")
</pallas_src>

<mosaic_0001>
module attributes {stable_mosaic.version = 11 : i64} {
  func.func @_encoder_kernel(%arg0: i32, %arg1: i32, %arg2: memref<2x8x32xf32, #tpu.memory_space<vmem>>, %arg3: memref<2x1x8xf32, #tpu.memory_space<vmem>>, %arg4: memref<1x32xf32, #tpu.memory_space<vmem>>, %arg5: memref<1x32xf32, #tpu.memory_space<vmem>>, %arg6: memref<1x32x96xbf16, #tpu.memory_space<vmem>>, %arg7: memref<1x1x96xf32, #tpu.memory_space<vmem>>, %arg8: memref<1x32x32xbf16, #tpu.memory_space<vmem>>, %arg9: memref<1x1x32xf32, #tpu.memory_space<vmem>>, %arg10: memref<1x1x32xf32, #tpu.memory_space<vmem>>, %arg11: memref<1x1x32xf32, #tpu.memory_space<vmem>>, %arg12: memref<1x32x64xbf16, #tpu.memory_space<vmem>>, %arg13: memref<1x1x64xf32, #tpu.memory_space<vmem>>, %arg14: memref<1x64x32xbf16, #tpu.memory_space<vmem>>, %arg15: memref<1x1x32xf32, #tpu.memory_space<vmem>>, %arg16: memref<1x1x32xf32, #tpu.memory_space<vmem>>, %arg17: memref<1x1x32xf32, #tpu.memory_space<vmem>>, %arg18: memref<32x128xbf16, #tpu.memory_space<vmem>>, %arg19: memref<1x128xf32, #tpu.memory_space<vmem>>, %arg20: memref<2x8x1xi32, #tpu.memory_space<vmem>>, %arg21: memref<16x32xf32, #tpu.memory_space<vmem>>, %arg22: memref<2x8x32xbf16, #tpu.memory_space<vmem>>) attributes {dimension_semantics = [#tpu.dimension_semantics<parallel>, #tpu.dimension_semantics<arbitrary>], iteration_bounds = array<i64: 1, 2>, scalar_prefetch = 0 : i64, scratch_operands = 2 : i64, tpu.core_type = #tpu.core_type<tc>, window_params = [{transform_indices = @transform_0, window_bounds = array<i64: 2, 8, 32>}, {transform_indices = @transform_1, window_bounds = array<i64: 2, 1, 8>}, {pipeline_mode = #tpu.pipeline_mode<synchronous>, transform_indices = @transform_2, window_bounds = array<i64: 1, 32>}, {pipeline_mode = #tpu.pipeline_mode<synchronous>, transform_indices = @transform_3, window_bounds = array<i64: 1, 32>}, {transform_indices = @transform_4, window_bounds = array<i64: 1, 32, 96>}, {transform_indices = @transform_5, window_bounds = array<i64: 1, 1, 96>}, {transform_indices = @transform_6, window_bounds = array<i64: 1, 32, 32>}, {transform_indices = @transform_7, window_bounds = array<i64: 1, 1, 32>}, {transform_indices = @transform_8, window_bounds = array<i64: 1, 1, 32>}, {transform_indices = @transform_9, window_bounds = array<i64: 1, 1, 32>}, {transform_indices = @transform_10, window_bounds = array<i64: 1, 32, 64>}, {transform_indices = @transform_11, window_bounds = array<i64: 1, 1, 64>}, {transform_indices = @transform_12, window_bounds = array<i64: 1, 64, 32>}, {transform_indices = @transform_13, window_bounds = array<i64: 1, 1, 32>}, {transform_indices = @transform_14, window_bounds = array<i64: 1, 1, 32>}, {transform_indices = @transform_15, window_bounds = array<i64: 1, 1, 32>}, {pipeline_mode = #tpu.pipeline_mode<synchronous>, transform_indices = @transform_16, window_bounds = array<i64: 32, 128>}, {pipeline_mode = #tpu.pipeline_mode<synchronous>, transform_indices = @transform_17, window_bounds = array<i64: 1, 128>}, {transform_indices = @transform_18, window_bounds = array<i64: 2, 8, 1>}]} {
    %c0_i32 = arith.constant 0 : i32
    %0 = arith.cmpi eq, %arg1, %c0_i32 : i32
    %1 = arith.extui %0 : i1 to i32
    %c0_i32_0 = arith.constant 0 : i32
    %2 = arith.cmpi ne, %1, %c0_i32_0 : i32
    scf.if %2 {
      %c0_78 = arith.constant 0 : index
      %c0_79 = arith.constant 0 : index
      %c0_80 = arith.constant 0 : index
      %160 = vector.load %arg2[%c0_78, %c0_79, %c0_80] : memref<2x8x32xf32, #tpu.memory_space<vmem>>, vector<2x8x32xf32>
      %161 = vector.shape_cast %160 : vector<2x8x32xf32> to vector<16x32xf32>
      %c0_81 = arith.constant 0 : index
      %c0_82 = arith.constant 0 : index
      %162 = vector.load %arg4[%c0_81, %c0_82] : memref<1x32xf32, #tpu.memory_space<vmem>>, vector<1x32xf32>
      %c0_83 = arith.constant 0 : index
      %c0_84 = arith.constant 0 : index
      %163 = vector.load %arg5[%c0_83, %c0_84] : memref<1x32xf32, #tpu.memory_space<vmem>>, vector<1x32xf32>
      %cst_85 = arith.constant dense<0.000000e+00> : vector<16xf32>
      %164 = vector.multi_reduction <add>, %161, %cst_85 [1] : vector<16x32xf32> to vector<16xf32>
      %165 = vector.shape_cast %164 : vector<16xf32> to vector<16x1xf32>
      %cst_86 = arith.constant 3.200000e+01 : f32
      %166 = vector.broadcast %cst_86 : f32 to vector<16x1xf32>
      %167 = arith.divf %165, %166 : vector<16x1xf32>
      %168 = vector.broadcast %167 : vector<16x1xf32> to vector<16x32xf32>
      %169 = arith.subf %161, %168 : vector<16x32xf32>
      %170 = arith.mulf %169, %169 : vector<16x32xf32>
      %cst_87 = arith.constant dense<0.000000e+00> : vector<16xf32>
      %171 = vector.multi_reduction <add>, %170, %cst_87 [1] : vector<16x32xf32> to vector<16xf32>
      %172 = vector.shape_cast %171 : vector<16xf32> to vector<16x1xf32>
      %cst_88 = arith.constant 3.200000e+01 : f32
      %173 = vector.broadcast %cst_88 : f32 to vector<16x1xf32>
      %174 = arith.divf %172, %173 : vector<16x1xf32>
      %175 = vector.broadcast %167 : vector<16x1xf32> to vector<16x32xf32>
      %176 = arith.subf %161, %175 : vector<16x32xf32>
      %cst_89 = arith.constant 9.99999996E-13 : f32
      %177 = vector.broadcast %cst_89 : f32 to vector<16x1xf32>
      %178 = arith.addf %174, %177 : vector<16x1xf32>
      %179 = math.rsqrt %178 : vector<16x1xf32>
      %180 = vector.broadcast %179 : vector<16x1xf32> to vector<16x32xf32>
      %181 = arith.mulf %176, %180 : vector<16x32xf32>
      %182 = vector.broadcast %162 : vector<1x32xf32> to vector<16x32xf32>
      %183 = arith.mulf %181, %182 : vector<16x32xf32>
      %184 = vector.broadcast %163 : vector<1x32xf32> to vector<16x32xf32>
      %185 = arith.addf %183, %184 : vector<16x32xf32>
      %c0_90 = arith.constant 0 : index
      %c0_91 = arith.constant 0 : index
      %186 = vector.load %arg21[%c0_90, %c0_91] : memref<16x32xf32, #tpu.memory_space<vmem>>, vector<16x32xf32>
      tpu.vector_store %arg21[%c0_90, %c0_91], %185 {strides = array<i32>} : memref<16x32xf32, #tpu.memory_space<vmem>>, vector<16x32xf32>,
    } else {
    }
    %c0 = arith.constant 0 : index
    %c0_1 = arith.constant 0 : index
    %3 = vector.load %arg21[%c0, %c0_1] : memref<16x32xf32, #tpu.memory_space<vmem>>, vector<16x32xf32>
    %4 = arith.truncf %3 : vector<16x32xf32> to vector<16x32xbf16>
    %c0_2 = arith.constant 0 : index
    %c0_3 = arith.constant 0 : index
    %c0_4 = arith.constant 0 : index
    %5 = vector.load %arg6[%c0_2, %c0_3, %c0_4] : memref<1x32x96xbf16, #tpu.memory_space<vmem>>, vector<1x32x96xbf16>
    %6 = vector.shape_cast %5 : vector<1x32x96xbf16> to vector<32x96xbf16>
    %cst = arith.constant dense<0.000000e+00> : vector<16x96xf32>
    %7 = tpu.matmul %4, %6, %cst {dimension_numbers = #tpu.dot_dimension_numbers<[1], [0], [0], [1], [0, 0, 1, 1], [], []>} : vector<16x32xbf16>, vector<32x96xbf16>, vector<16x96xf32> -> vector<16x96xf32>
    %c0_5 = arith.constant 0 : index
    %c0_6 = arith.constant 0 : index
    %c0_7 = arith.constant 0 : index
    %8 = vector.load %arg7[%c0_5, %c0_6, %c0_7] : memref<1x1x96xf32, #tpu.memory_space<vmem>>, vector<1x1x96xf32>
    %9 = vector.shape_cast %8 : vector<1x1x96xf32> to vector<1x96xf32>
    %10 = vector.broadcast %9 : vector<1x96xf32> to vector<16x96xf32>
    %11 = arith.addf %7, %10 : vector<16x96xf32>
    %12 = vector.extract_strided_slice %11 {offsets = [0, 0], sizes = [16, 32], strides = [1, 1]} : vector<16x96xf32> to vector<16x32xf32>
    %cst_8 = arith.constant 2.500000e-01 : f32
    %13 = vector.broadcast %cst_8 : f32 to vector<16x32xf32>
    %14 = arith.mulf %12, %13 : vector<16x32xf32>
    %15 = arith.truncf %14 : vector<16x32xf32> to vector<16x32xbf16>
    %16 = vector.shape_cast %15 : vector<16x32xbf16> to vector<2x8x32xbf16>
    %17 = vector.extract_strided_slice %11 {offsets = [0, 32], sizes = [16, 32], strides = [1, 1]} : vector<16x96xf32> to vector<16x32xf32>
    %18 = arith.truncf %17 : vector<16x32xf32> to vector<16x32xbf16>
    %19 = vector.shape_cast %18 : vector<16x32xbf16> to vector<2x8x32xbf16>
    %20 = vector.extract_strided_slice %11 {offsets = [0, 64], sizes = [16, 32], strides = [1, 1]} : vector<16x96xf32> to vector<16x32xf32>
    %21 = arith.truncf %20 : vector<16x32xf32> to vector<16x32xbf16>
    %22 = vector.shape_cast %21 : vector<16x32xbf16> to vector<2x8x32xbf16>
    %c0_9 = arith.constant 0 : index
    %c0_10 = arith.constant 0 : index
    %c0_11 = arith.constant 0 : index
    %23 = vector.load %arg3[%c0_9, %c0_10, %c0_11] : memref<2x1x8xf32, #tpu.memory_space<vmem>>, vector<2x1x8xf32>
    %24 = vector.shape_cast %23 : vector<2x1x8xf32> to vector<2x1x8xf32>
    %25 = vector.broadcast %24 : vector<2x1x8xf32> to vector<2x8x8xf32>
    %26 = vector.extract_strided_slice %16 {offsets = [0, 0, 0], sizes = [2, 8, 16], strides = [1, 1, 1]} : vector<2x8x32xbf16> to vector<2x8x16xbf16>
    %27 = vector.extract_strided_slice %19 {offsets = [0, 0, 0], sizes = [2, 8, 16], strides = [1, 1, 1]} : vector<2x8x32xbf16> to vector<2x8x16xbf16>
    "tpu.trace_start"() <{level = 10 : i32, message = "bqd,bkd->bqk"}> : () -> ()
    %cst_12 = arith.constant dense<0.000000e+00> : vector<2x8x8xf32>
    %28 = tpu.matmul %26, %27, %cst_12 {dimension_numbers = #tpu.dot_dimension_numbers<[2], [2], [1], [1], [0, 0, 0, 1, 1, 1], [0], [0]>} : vector<2x8x16xbf16>, vector<2x8x16xbf16>, vector<2x8x8xf32> -> vector<2x8x8xf32>
    "tpu.trace_stop"() : () -> ()
    %29 = arith.addf %28, %25 : vector<2x8x8xf32>
    %cst_13 = arith.constant dense<0xFF800000> : vector<2x8xf32>
    %30 = vector.multi_reduction <maximumf>, %29, %cst_13 [2] : vector<2x8x8xf32> to vector<2x8xf32>
    %31 = vector.shape_cast %30 : vector<2x8xf32> to vector<2x8x1xf32>
    %32 = vector.broadcast %31 : vector<2x8x1xf32> to vector<2x8x8xf32>
    %33 = arith.subf %29, %32 : vector<2x8x8xf32>
    %34 = math.exp %33 : vector<2x8x8xf32>
    %cst_14 = arith.constant dense<0.000000e+00> : vector<2x8xf32>
    %35 = vector.multi_reduction <add>, %34, %cst_14 [2] : vector<2x8x8xf32> to vector<2x8xf32>
    %36 = vector.shape_cast %35 : vector<2x8xf32> to vector<2x8x1xf32>
    %37 = tpu.reciprocal %36 {approx = true} : vector<2x8x1xf32> -> vector<2x8x1xf32>
    %38 = vector.broadcast %37 : vector<2x8x1xf32> to vector<2x8x8xf32>
    %39 = arith.mulf %34, %38 : vector<2x8x8xf32>
    %40 = arith.truncf %39 : vector<2x8x8xf32> to vector<2x8x8xbf16>
    %41 = vector.extract_strided_slice %22 {offsets = [0, 0, 0], sizes = [2, 8, 16], strides = [1, 1, 1]} : vector<2x8x32xbf16> to vector<2x8x16xbf16>
    "tpu.trace_start"() <{level = 10 : i32, message = "bqk,bkd->bqd"}> : () -> ()
    %cst_15 = arith.constant dense<0.000000e+00> : vector<2x8x16xf32>
    %42 = tpu.matmul %40, %41, %cst_15 {dimension_numbers = #tpu.dot_dimension_numbers<[2], [1], [1], [2], [0, 0, 0, 1, 1, 2], [0], [0]>} : vector<2x8x8xbf16>, vector<2x8x16xbf16>, vector<2x8x16xf32> -> vector<2x8x16xf32>
    "tpu.trace_stop"() : () -> ()
    %43 = arith.truncf %42 : vector<2x8x16xf32> to vector<2x8x16xbf16>
    %c0_16 = arith.constant 0 : index
    %c0_17 = arith.constant 0 : index
    %c0_18 = arith.constant 0 : index
    %44 = vector.load %arg22[%c0_16, %c0_17, %c0_18] : memref<2x8x32xbf16, #tpu.memory_space<vmem>>, vector<2x8x16xbf16>
    tpu.vector_store %arg22[%c0_16, %c0_17, %c0_18], %43 {strides = array<i32>} : memref<2x8x32xbf16, #tpu.memory_space<vmem>>, vector<2x8x16xbf16>,
    %45 = vector.extract_strided_slice %16 {offsets = [0, 0, 16], sizes = [2, 8, 16], strides = [1, 1, 1]} : vector<2x8x32xbf16> to vector<2x8x16xbf16>
    %46 = vector.extract_strided_slice %19 {offsets = [0, 0, 16], sizes = [2, 8, 16], strides = [1, 1, 1]} : vector<2x8x32xbf16> to vector<2x8x16xbf16>
    "tpu.trace_start"() <{level = 10 : i32, message = "bqd,bkd->bqk"}> : () -> ()
    %cst_19 = arith.constant dense<0.000000e+00> : vector<2x8x8xf32>
    %47 = tpu.matmul %45, %46, %cst_19 {dimension_numbers = #tpu.dot_dimension_numbers<[2], [2], [1], [1], [0, 0, 0, 1, 1, 1], [0], [0]>} : vector<2x8x16xbf16>, vector<2x8x16xbf16>, vector<2x8x8xf32> -> vector<2x8x8xf32>
    "tpu.trace_stop"() : () -> ()
    %48 = arith.addf %47, %25 : vector<2x8x8xf32>
    %cst_20 = arith.constant dense<0xFF800000> : vector<2x8xf32>
    %49 = vector.multi_reduction <maximumf>, %48, %cst_20 [2] : vector<2x8x8xf32> to vector<2x8xf32>
    %50 = vector.shape_cast %49 : vector<2x8xf32> to vector<2x8x1xf32>
    %51 = vector.broadcast %50 : vector<2x8x1xf32> to vector<2x8x8xf32>
    %52 = arith.subf %48, %51 : vector<2x8x8xf32>
    %53 = math.exp %52 : vector<2x8x8xf32>
    %cst_21 = arith.constant dense<0.000000e+00> : vector<2x8xf32>
    %54 = vector.multi_reduction <add>, %53, %cst_21 [2] : vector<2x8x8xf32> to vector<2x8xf32>
    %55 = vector.shape_cast %54 : vector<2x8xf32> to vector<2x8x1xf32>
    %56 = tpu.reciprocal %55 {approx = true} : vector<2x8x1xf32> -> vector<2x8x1xf32>
    %57 = vector.broadcast %56 : vector<2x8x1xf32> to vector<2x8x8xf32>
    %58 = arith.mulf %53, %57 : vector<2x8x8xf32>
    %59 = arith.truncf %58 : vector<2x8x8xf32> to vector<2x8x8xbf16>
    %60 = vector.extract_strided_slice %22 {offsets = [0, 0, 16], sizes = [2, 8, 16], strides = [1, 1, 1]} : vector<2x8x32xbf16> to vector<2x8x16xbf16>
    "tpu.trace_start"() <{level = 10 : i32, message = "bqk,bkd->bqd"}> : () -> ()
    %cst_22 = arith.constant dense<0.000000e+00> : vector<2x8x16xf32>
    %61 = tpu.matmul %59, %60, %cst_22 {dimension_numbers = #tpu.dot_dimension_numbers<[2], [1], [1], [2], [0, 0, 0, 1, 1, 2], [0], [0]>} : vector<2x8x8xbf16>, vector<2x8x16xbf16>, vector<2x8x16xf32> -> vector<2x8x16xf32>
    "tpu.trace_stop"() : () -> ()
    %62 = arith.truncf %61 : vector<2x8x16xf32> to vector<2x8x16xbf16>
    %c0_23 = arith.constant 0 : index
    %c0_24 = arith.constant 0 : index
    %c16 = arith.constant 16 : index
    %63 = vector.load %arg22[%c0_23, %c0_24, %c16] : memref<2x8x32xbf16, #tpu.memory_space<vmem>>, vector<2x8x16xbf16>
    tpu.vector_store %arg22[%c0_23, %c0_24, %c16], %62 {strides = array<i32>} : memref<2x8x32xbf16, #tpu.memory_space<vmem>>, vector<2x8x16xbf16>,
    %c0_25 = arith.constant 0 : index
    %c0_26 = arith.constant 0 : index
    %c0_27 = arith.constant 0 : index
    %64 = vector.load %arg22[%c0_25, %c0_26, %c0_27] : memref<2x8x32xbf16, #tpu.memory_space<vmem>>, vector<2x8x32xbf16>
    %65 = vector.shape_cast %64 : vector<2x8x32xbf16> to vector<16x32xbf16>
    %c0_28 = arith.constant 0 : index
    %c0_29 = arith.constant 0 : index
    %c0_30 = arith.constant 0 : index
    %66 = vector.load %arg8[%c0_28, %c0_29, %c0_30] : memref<1x32x32xbf16, #tpu.memory_space<vmem>>, vector<1x32x32xbf16>
    %67 = vector.shape_cast %66 : vector<1x32x32xbf16> to vector<32x32xbf16>
    %cst_31 = arith.constant dense<0.000000e+00> : vector<16x32xf32>
    %68 = tpu.matmul %65, %67, %cst_31 {dimension_numbers = #tpu.dot_dimension_numbers<[1], [0], [0], [1], [0, 0, 1, 1], [], []>} : vector<16x32xbf16>, vector<32x32xbf16>, vector<16x32xf32> -> vector<16x32xf32>
    %c0_32 = arith.constant 0 : index
    %c0_33 = arith.constant 0 : index
    %c0_34 = arith.constant 0 : index
    %69 = vector.load %arg9[%c0_32, %c0_33, %c0_34] : memref<1x1x32xf32, #tpu.memory_space<vmem>>, vector<1x1x32xf32>
    %70 = vector.shape_cast %69 : vector<1x1x32xf32> to vector<1x32xf32>
    %71 = vector.broadcast %70 : vector<1x32xf32> to vector<16x32xf32>
    %72 = arith.addf %68, %71 : vector<16x32xf32>
    %73 = arith.addf %3, %72 : vector<16x32xf32>
    %c0_35 = arith.constant 0 : index
    %c0_36 = arith.constant 0 : index
    %c0_37 = arith.constant 0 : index
    %74 = vector.load %arg10[%c0_35, %c0_36, %c0_37] : memref<1x1x32xf32, #tpu.memory_space<vmem>>, vector<1x1x32xf32>
    %75 = vector.shape_cast %74 : vector<1x1x32xf32> to vector<1x32xf32>
    %c0_38 = arith.constant 0 : index
    %c0_39 = arith.constant 0 : index
    %c0_40 = arith.constant 0 : index
    %76 = vector.load %arg11[%c0_38, %c0_39, %c0_40] : memref<1x1x32xf32, #tpu.memory_space<vmem>>, vector<1x1x32xf32>
    %77 = vector.shape_cast %76 : vector<1x1x32xf32> to vector<1x32xf32>
    %cst_41 = arith.constant dense<0.000000e+00> : vector<16xf32>
    %78 = vector.multi_reduction <add>, %73, %cst_41 [1] : vector<16x32xf32> to vector<16xf32>
    %79 = vector.shape_cast %78 : vector<16xf32> to vector<16x1xf32>
    %cst_42 = arith.constant 3.200000e+01 : f32
    %80 = vector.broadcast %cst_42 : f32 to vector<16x1xf32>
    %81 = arith.divf %79, %80 : vector<16x1xf32>
    %82 = vector.broadcast %81 : vector<16x1xf32> to vector<16x32xf32>
    %83 = arith.subf %73, %82 : vector<16x32xf32>
    %84 = arith.mulf %83, %83 : vector<16x32xf32>
    %cst_43 = arith.constant dense<0.000000e+00> : vector<16xf32>
    %85 = vector.multi_reduction <add>, %84, %cst_43 [1] : vector<16x32xf32> to vector<16xf32>
    %86 = vector.shape_cast %85 : vector<16xf32> to vector<16x1xf32>
    %cst_44 = arith.constant 3.200000e+01 : f32
    %87 = vector.broadcast %cst_44 : f32 to vector<16x1xf32>
    %88 = arith.divf %86, %87 : vector<16x1xf32>
    %89 = vector.broadcast %81 : vector<16x1xf32> to vector<16x32xf32>
    %90 = arith.subf %73, %89 : vector<16x32xf32>
    %cst_45 = arith.constant 9.99999996E-13 : f32
    %91 = vector.broadcast %cst_45 : f32 to vector<16x1xf32>
    %92 = arith.addf %88, %91 : vector<16x1xf32>
    %93 = math.rsqrt %92 : vector<16x1xf32>
    %94 = vector.broadcast %93 : vector<16x1xf32> to vector<16x32xf32>
    %95 = arith.mulf %90, %94 : vector<16x32xf32>
    %96 = vector.broadcast %75 : vector<1x32xf32> to vector<16x32xf32>
    %97 = arith.mulf %95, %96 : vector<16x32xf32>
    %98 = vector.broadcast %77 : vector<1x32xf32> to vector<16x32xf32>
    %99 = arith.addf %97, %98 : vector<16x32xf32>
    %100 = arith.truncf %99 : vector<16x32xf32> to vector<16x32xbf16>
    %c0_46 = arith.constant 0 : index
    %c0_47 = arith.constant 0 : index
    %c0_48 = arith.constant 0 : index
    %101 = vector.load %arg12[%c0_46, %c0_47, %c0_48] : memref<1x32x64xbf16, #tpu.memory_space<vmem>>, vector<1x32x64xbf16>
    %102 = vector.shape_cast %101 : vector<1x32x64xbf16> to vector<32x64xbf16>
    %cst_49 = arith.constant dense<0.000000e+00> : vector<16x64xf32>
    %103 = tpu.matmul %100, %102, %cst_49 {dimension_numbers = #tpu.dot_dimension_numbers<[1], [0], [0], [1], [0, 0, 1, 1], [], []>} : vector<16x32xbf16>, vector<32x64xbf16>, vector<16x64xf32> -> vector<16x64xf32>
    %c0_50 = arith.constant 0 : index
    %c0_51 = arith.constant 0 : index
    %c0_52 = arith.constant 0 : index
    %104 = vector.load %arg13[%c0_50, %c0_51, %c0_52] : memref<1x1x64xf32, #tpu.memory_space<vmem>>, vector<1x1x64xf32>
    %105 = vector.shape_cast %104 : vector<1x1x64xf32> to vector<1x64xf32>
    %106 = vector.broadcast %105 : vector<1x64xf32> to vector<16x64xf32>
    %107 = arith.addf %103, %106 : vector<16x64xf32>
    %108 = arith.mulf %107, %107 : vector<16x64xf32>
    %109 = arith.mulf %107, %108 : vector<16x64xf32>
    %cst_53 = arith.constant 4.471500e-02 : f32
    %110 = vector.broadcast %cst_53 : f32 to vector<16x64xf32>
    %111 = arith.mulf %110, %109 : vector<16x64xf32>
    %112 = arith.addf %107, %111 : vector<16x64xf32>
    %cst_54 = arith.constant 0.797884583 : f32
    %113 = vector.broadcast %cst_54 : f32 to vector<16x64xf32>
    %114 = arith.mulf %113, %112 : vector<16x64xf32>
    %115 = math.tanh %114 : vector<16x64xf32>
    %cst_55 = arith.constant 1.000000e+00 : f32
    %116 = vector.broadcast %cst_55 : f32 to vector<16x64xf32>
    %117 = arith.addf %116, %115 : vector<16x64xf32>
    %cst_56 = arith.constant 5.000000e-01 : f32
    %118 = vector.broadcast %cst_56 : f32 to vector<16x64xf32>
    %119 = arith.mulf %118, %117 : vector<16x64xf32>
    %120 = arith.mulf %107, %119 : vector<16x64xf32>
    %121 = arith.truncf %120 : vector<16x64xf32> to vector<16x64xbf16>
    %c0_57 = arith.constant 0 : index
    %c0_58 = arith.constant 0 : index
    %c0_59 = arith.constant 0 : index
    %122 = vector.load %arg14[%c0_57, %c0_58, %c0_59] : memref<1x64x32xbf16, #tpu.memory_space<vmem>>, vector<1x64x32xbf16>
    %123 = vector.shape_cast %122 : vector<1x64x32xbf16> to vector<64x32xbf16>
    %cst_60 = arith.constant dense<0.000000e+00> : vector<16x32xf32>
    %124 = tpu.matmul %121, %123, %cst_60 {dimension_numbers = #tpu.dot_dimension_numbers<[1], [0], [0], [1], [0, 0, 1, 1], [], []>} : vector<16x64xbf16>, vector<64x32xbf16>, vector<16x32xf32> -> vector<16x32xf32>
    %c0_61 = arith.constant 0 : index
    %c0_62 = arith.constant 0 : index
    %c0_63 = arith.constant 0 : index
    %125 = vector.load %arg15[%c0_61, %c0_62, %c0_63] : memref<1x1x32xf32, #tpu.memory_space<vmem>>, vector<1x1x32xf32>
    %126 = vector.shape_cast %125 : vector<1x1x32xf32> to vector<1x32xf32>
    %127 = vector.broadcast %126 : vector<1x32xf32> to vector<16x32xf32>
    %128 = arith.addf %124, %127 : vector<16x32xf32>
    %129 = arith.addf %99, %128 : vector<16x32xf32>
    %c0_64 = arith.constant 0 : index
    %c0_65 = arith.constant 0 : index
    %c0_66 = arith.constant 0 : index
    %130 = vector.load %arg16[%c0_64, %c0_65, %c0_66] : memref<1x1x32xf32, #tpu.memory_space<vmem>>, vector<1x1x32xf32>
    %131 = vector.shape_cast %130 : vector<1x1x32xf32> to vector<1x32xf32>
    %c0_67 = arith.constant 0 : index
    %c0_68 = arith.constant 0 : index
    %c0_69 = arith.constant 0 : index
    %132 = vector.load %arg17[%c0_67, %c0_68, %c0_69] : memref<1x1x32xf32, #tpu.memory_space<vmem>>, vector<1x1x32xf32>
    %133 = vector.shape_cast %132 : vector<1x1x32xf32> to vector<1x32xf32>
    %cst_70 = arith.constant dense<0.000000e+00> : vector<16xf32>
    %134 = vector.multi_reduction <add>, %129, %cst_70 [1] : vector<16x32xf32> to vector<16xf32>
    %135 = vector.shape_cast %134 : vector<16xf32> to vector<16x1xf32>
    %cst_71 = arith.constant 3.200000e+01 : f32
    %136 = vector.broadcast %cst_71 : f32 to vector<16x1xf32>
    %137 = arith.divf %135, %136 : vector<16x1xf32>
    %138 = vector.broadcast %137 : vector<16x1xf32> to vector<16x32xf32>
    %139 = arith.subf %129, %138 : vector<16x32xf32>
    %140 = arith.mulf %139, %139 : vector<16x32xf32>
    %cst_72 = arith.constant dense<0.000000e+00> : vector<16xf32>
    %141 = vector.multi_reduction <add>, %140, %cst_72 [1] : vector<16x32xf32> to vector<16xf32>
    %142 = vector.shape_cast %141 : vector<16xf32> to vector<16x1xf32>
    %cst_73 = arith.constant 3.200000e+01 : f32
    %143 = vector.broadcast %cst_73 : f32 to vector<16x1xf32>
    %144 = arith.divf %142, %143 : vector<16x1xf32>
    %145 = vector.broadcast %137 : vector<16x1xf32> to vector<16x32xf32>
    %146 = arith.subf %129, %145 : vector<16x32xf32>
    %cst_74 = arith.constant 9.99999996E-13 : f32
    %147 = vector.broadcast %cst_74 : f32 to vector<16x1xf32>
    %148 = arith.addf %144, %147 : vector<16x1xf32>
    %149 = math.rsqrt %148 : vector<16x1xf32>
    %150 = vector.broadcast %149 : vector<16x1xf32> to vector<16x32xf32>
    %151 = arith.mulf %146, %150 : vector<16x32xf32>
    %152 = vector.broadcast %131 : vector<1x32xf32> to vector<16x32xf32>
    %153 = arith.mulf %151, %152 : vector<16x32xf32>
    %154 = vector.broadcast %133 : vector<1x32xf32> to vector<16x32xf32>
    %155 = arith.addf %153, %154 : vector<16x32xf32>
    %c0_75 = arith.constant 0 : index
    %c0_76 = arith.constant 0 : index
    %156 = vector.load %arg21[%c0_75, %c0_76] : memref<16x32xf32, #tpu.memory_space<vmem>>, vector<16x32xf32>
    tpu.vector_store %arg21[%c0_75, %c0_76], %155 {strides = array<i32>} : memref<16x32xf32, #tpu.memory_space<vmem>>, vector<16x32xf32>,
    %c1_i32 = arith.constant 1 : i32
    %157 = arith.cmpi eq, %arg1, %c1_i32 : i32
    %158 = arith.extui %157 : i1 to i32
    %c0_i32_77 = arith.constant 0 : i32
    %159 = arith.cmpi ne, %158, %c0_i32_77 : i32
    scf.if %159 {
      %160 = arith.truncf %155 : vector<16x32xf32> to vector<16x32xbf16>
      %c0_78 = arith.constant 0 : index
      %c0_79 = arith.constant 0 : index
      %161 = vector.load %arg18[%c0_78, %c0_79] : memref<32x128xbf16, #tpu.memory_space<vmem>>, vector<32x128xbf16>
      %cst_80 = arith.constant dense<0.000000e+00> : vector<16x128xf32>
      %162 = tpu.matmul %160, %161, %cst_80 {dimension_numbers = #tpu.dot_dimension_numbers<[1], [0], [0], [1], [0, 0, 1, 1], [], []>} : vector<16x32xbf16>, vector<32x128xbf16>, vector<16x128xf32> -> vector<16x128xf32>
      %c0_81 = arith.constant 0 : index
      %c0_82 = arith.constant 0 : index
      %163 = vector.load %arg19[%c0_81, %c0_82] : memref<1x128xf32, #tpu.memory_space<vmem>>, vector<1x128xf32>
      %164 = vector.broadcast %163 : vector<1x128xf32> to vector<16x128xf32>
      %165 = arith.addf %162, %164 : vector<16x128xf32>
      %cst_83 = arith.constant dense<0xFF800000> : vector<16xf32>
      %166 = vector.multi_reduction <maximumf>, %165, %cst_83 [1] : vector<16x128xf32> to vector<16xf32>
      %167 = vector.shape_cast %166 : vector<16xf32> to vector<16x1xf32>
      %168 = tpu.iota {dimensions = array<i32: 1>} : vector<16x128xi32>
      %169 = vector.broadcast %167 : vector<16x1xf32> to vector<16x128xf32>
      %170 = arith.cmpf oeq, %165, %169 : vector<16x128xf32>
      %c1073741824_i32 = arith.constant 1073741824 : i32
      %171 = vector.broadcast %c1073741824_i32 : i32 to vector<16x128xi32>
      %172 = arith.select %170, %168, %171 : vector<16x128xi1>, vector<16x128xi32>
      %cst_84 = arith.constant dense<2147483647> : vector<16xi32>
      %173 = vector.multi_reduction <minsi>, %172, %cst_84 [1] : vector<16x128xi32> to vector<16xi32>
      %174 = vector.shape_cast %173 : vector<16xi32> to vector<16x1xi32>
      %175 = vector.shape_cast %174 : vector<16x1xi32> to vector<2x8x1xi32>
      %c0_85 = arith.constant 0 : index
      %c0_86 = arith.constant 0 : index
      %c0_87 = arith.constant 0 : index
      %176 = vector.load %arg20[%c0_85, %c0_86, %c0_87] : memref<2x8x1xi32, #tpu.memory_space<vmem>>, vector<2x8x1xi32>
      tpu.vector_store %arg20[%c0_85, %c0_86, %c0_87], %175 {strides = array<i32>} : memref<2x8x1xi32, #tpu.memory_space<vmem>>, vector<2x8x1xi32>,
    } else {
    }
    return
  }
  func.func @transform_0(%arg0: i32, %arg1: i32) -> (i32, i32, i32) {
    %c0_i32 = arith.constant 0 : i32
    %c0_i32_0 = arith.constant 0 : i32
    %c0_i32_1 = arith.constant 0 : i32
    return %arg0, %c0_i32, %c0_i32_0 : i32, i32, i32
  }
  func.func @transform_1(%arg0: i32, %arg1: i32) -> (i32, i32, i32) {
    %c0_i32 = arith.constant 0 : i32
    %c0_i32_0 = arith.constant 0 : i32
    %c0_i32_1 = arith.constant 0 : i32
    return %arg0, %c0_i32, %c0_i32_0 : i32, i32, i32
  }
  func.func @transform_2(%arg0: i32, %arg1: i32) -> (i32, i32) {
    %c0_i32 = arith.constant 0 : i32
    %c0_i32_0 = arith.constant 0 : i32
    %c0_i32_1 = arith.constant 0 : i32
    return %c0_i32, %c0_i32_0 : i32, i32
  }
  func.func @transform_3(%arg0: i32, %arg1: i32) -> (i32, i32) {
    %c0_i32 = arith.constant 0 : i32
    %c0_i32_0 = arith.constant 0 : i32
    %c0_i32_1 = arith.constant 0 : i32
    return %c0_i32, %c0_i32_0 : i32, i32
  }
  func.func @transform_4(%arg0: i32, %arg1: i32) -> (i32, i32, i32) {
    %c0_i32 = arith.constant 0 : i32
    %c0_i32_0 = arith.constant 0 : i32
    %c0_i32_1 = arith.constant 0 : i32
    return %arg1, %c0_i32, %c0_i32_0 : i32, i32, i32
  }
  func.func @transform_5(%arg0: i32, %arg1: i32) -> (i32, i32, i32) {
    %c0_i32 = arith.constant 0 : i32
    %c0_i32_0 = arith.constant 0 : i32
    %c0_i32_1 = arith.constant 0 : i32
    return %arg1, %c0_i32, %c0_i32_0 : i32, i32, i32
  }
  func.func @transform_6(%arg0: i32, %arg1: i32) -> (i32, i32, i32) {
    %c0_i32 = arith.constant 0 : i32
    %c0_i32_0 = arith.constant 0 : i32
    %c0_i32_1 = arith.constant 0 : i32
    return %arg1, %c0_i32, %c0_i32_0 : i32, i32, i32
  }
  func.func @transform_7(%arg0: i32, %arg1: i32) -> (i32, i32, i32) {
    %c0_i32 = arith.constant 0 : i32
    %c0_i32_0 = arith.constant 0 : i32
    %c0_i32_1 = arith.constant 0 : i32
    return %arg1, %c0_i32, %c0_i32_0 : i32, i32, i32
  }
  func.func @transform_8(%arg0: i32, %arg1: i32) -> (i32, i32, i32) {
    %c0_i32 = arith.constant 0 : i32
    %c0_i32_0 = arith.constant 0 : i32
    %c0_i32_1 = arith.constant 0 : i32
    return %arg1, %c0_i32, %c0_i32_0 : i32, i32, i32
  }
  func.func @transform_9(%arg0: i32, %arg1: i32) -> (i32, i32, i32) {
    %c0_i32 = arith.constant 0 : i32
    %c0_i32_0 = arith.constant 0 : i32
    %c0_i32_1 = arith.constant 0 : i32
    return %arg1, %c0_i32, %c0_i32_0 : i32, i32, i32
  }
  func.func @transform_10(%arg0: i32, %arg1: i32) -> (i32, i32, i32) {
    %c0_i32 = arith.constant 0 : i32
    %c0_i32_0 = arith.constant 0 : i32
    %c0_i32_1 = arith.constant 0 : i32
    return %arg1, %c0_i32, %c0_i32_0 : i32, i32, i32
  }
  func.func @transform_11(%arg0: i32, %arg1: i32) -> (i32, i32, i32) {
    %c0_i32 = arith.constant 0 : i32
    %c0_i32_0 = arith.constant 0 : i32
    %c0_i32_1 = arith.constant 0 : i32
    return %arg1, %c0_i32, %c0_i32_0 : i32, i32, i32
  }
  func.func @transform_12(%arg0: i32, %arg1: i32) -> (i32, i32, i32) {
    %c0_i32 = arith.constant 0 : i32
    %c0_i32_0 = arith.constant 0 : i32
    %c0_i32_1 = arith.constant 0 : i32
    return %arg1, %c0_i32, %c0_i32_0 : i32, i32, i32
  }
  func.func @transform_13(%arg0: i32, %arg1: i32) -> (i32, i32, i32) {
    %c0_i32 = arith.constant 0 : i32
    %c0_i32_0 = arith.constant 0 : i32
    %c0_i32_1 = arith.constant 0 : i32
    return %arg1, %c0_i32, %c0_i32_0 : i32, i32, i32
  }
  func.func @transform_14(%arg0: i32, %arg1: i32) -> (i32, i32, i32) {
    %c0_i32 = arith.constant 0 : i32
    %c0_i32_0 = arith.constant 0 : i32
    %c0_i32_1 = arith.constant 0 : i32
    return %arg1, %c0_i32, %c0_i32_0 : i32, i32, i32
  }
  func.func @transform_15(%arg0: i32, %arg1: i32) -> (i32, i32, i32) {
    %c0_i32 = arith.constant 0 : i32
    %c0_i32_0 = arith.constant 0 : i32
    %c0_i32_1 = arith.constant 0 : i32
    return %arg1, %c0_i32, %c0_i32_0 : i32, i32, i32
  }
  func.func @transform_16(%arg0: i32, %arg1: i32) -> (i32, i32) {
    %c0_i32 = arith.constant 0 : i32
    %c0_i32_0 = arith.constant 0 : i32
    %c0_i32_1 = arith.constant 0 : i32
    return %c0_i32, %c0_i32_0 : i32, i32
  }
  func.func @transform_17(%arg0: i32, %arg1: i32) -> (i32, i32) {
    %c0_i32 = arith.constant 0 : i32
    %c0_i32_0 = arith.constant 0 : i32
    %c0_i32_1 = arith.constant 0 : i32
    return %c0_i32, %c0_i32_0 : i32, i32
  }
  func.func @transform_18(%arg0: i32, %arg1: i32) -> (i32, i32, i32) {
    %c0_i32 = arith.constant 0 : i32
    %c0_i32_0 = arith.constant 0 : i32
    %c0_i32_1 = arith.constant 0 : i32
    return %arg0, %c0_i32, %c0_i32_0 : i32, i32, i32
  }
}

</mosaic_0001>

<bundles_post_ra>
// kernel: tpu_custom_call.1
= control target key start
LH: loop header
LB: loop body
LE: loop exit
PB: predicated region body
PF: predicated region fallthrough
CT: control target
= control target key end

     0   :  { %s2834_s0 = inlined_call_operand.hbm [shape: f32[2,8,32], index: 0, kind: input, shape index: {}]   ;;  %s2835_s1 = inlined_call_operand.hbm [shape: f32[2,1,8], index: 1, kind: input, shape index: {}]   ;;  %s2836_s2 = inlined_call_operand.vmem [shape: f32[1,32], index: 2, kind: input, shape index: {}]   ;;  %s2837_s3 = inlined_call_operand.hbm [shape: f32[1,32], index: 3, kind: input, shape index: {}]   ;;  %s2838_s4 = inlined_call_operand.vmem [shape: bf16[2,32,96], index: 4, kind: input, shape index: {}]   ;;  %s2839_s5 = inlined_call_operand.vmem [shape: f32[2,1,96], index: 5, kind: input, shape index: {}]   ;;  %s2840_s6 = inlined_call_operand.vmem [shape: bf16[2,32,32], index: 6, kind: input, shape index: {}]   ;;  %s2841_s7 = inlined_call_operand.vmem [shape: f32[2,1,32], index: 7, kind: input, shape index: {}]   ;;  %s2842_s8 = inlined_call_operand.vmem [shape: f32[2,1,32], index: 8, kind: input, shape index: {}]   ;;  %s2843_s9 = inlined_call_operand.hbm [shape: f32[2,1,32], index: 9, kind: input, shape index: {}]   ;;  %s2844_s10 = inlined_call_operand.vmem [shape: bf16[2,32,64], index: 10, kind: input, shape index: {}]   ;;  %s2845_s11 = inlined_call_operand.vmem [shape: f32[2,1,64], index: 11, kind: input, shape index: {}]   ;;  %s2846_s12 = inlined_call_operand.vmem [shape: bf16[2,64,32], index: 12, kind: input, shape index: {}]   ;;  %s2847_s13 = inlined_call_operand.vmem [shape: f32[2,1,32], index: 13, kind: input, shape index: {}]   ;;  %s2848_s14 = inlined_call_operand.vmem [shape: f32[2,1,32], index: 14, kind: input, shape index: {}]   ;;  %s2849_s15 = inlined_call_operand.hbm [shape: f32[2,1,32], index: 15, kind: input, shape index: {}]   ;;  %s2850_s16 = inlined_call_operand.hbm [shape: bf16[32,128], index: 16, kind: input, shape index: {}]   ;;  %s2851_s17 = inlined_call_operand.vmem [shape: f32[1,128], index: 17, kind: input, shape index: {}]   ;;  %s2852_s18 = inlined_call_operand.vmem [shape: s32[2,8,1], index: 18, kind: output, shape index: {}]  }
   0x1   :  { %2860 = sst [smem:[#allocation23_spill]] %s2834_s0 }
   0x2   :  { %2861 = sst [smem:[#allocation24_spill]] %s2835_s1 }
   0x3   :  { %2862 = sst [smem:[#allocation25_spill]] %s2836_s2 }
   0x4   :  { %2863 = sst [smem:[#allocation26_spill]] %s2837_s3 }
   0x5   :  { %2864 = sst [smem:[#allocation27_spill]] %s2838_s4 }
   0x6   :  { %2865 = sst [smem:[#allocation28_spill]] %s2840_s6 }
   0x7   :  { %2866 = sst [smem:[#allocation29_spill]] %s2842_s8 }
   0x8   :  { %2867 = sst [smem:[#allocation30_spill]] %s2843_s9 }
   0x9   :  { %2868 = sst [smem:[#allocation31_spill]] %s2844_s10 }
   0xa   :  { %2869 = sst [smem:[#allocation32_spill]] %s2845_s11 }
   0xb   :  { %2870 = sst [smem:[#allocation33_spill]] %s2846_s12 }
   0xc   :  { %2871 = sst [smem:[#allocation34_spill]] %s2847_s13 }
   0xd   :  { %2872 = sst [smem:[#allocation35_spill]] %s2848_s14 }
   0xe   :  { %2873 = sst [smem:[#allocation36_spill]] %s2849_s15 }
   0xf   :  { %2874 = sst [smem:[#allocation37_spill]] %s2850_s16 }
  0x10   :  { %2875 = sst [smem:[#allocation38_spill]] %s2851_s17 }
  0x11   :  { %2876 = sst [smem:[#allocation39_spill]] %s2852_s18 }
  0x12   :  { %23 = vsyncpa [#allocation5], 0 }
  0x13   :  { %24 = vsyncpa [#allocation7], 0 }
  0x14   :  { %25 = vsyncpa [#allocation10], 0 }
  0x15   :  { %27 = vsyncpa [#allocation10 + $0x1], 0 }
  0x16   :  { %28 = vsyncpa [#allocation13], 0  ;;  %s2487_s27 = smov 0   ;;  %s2489_s28 = smov 0  }
  0x17   :  { %s2491_s29 = smov 0   ;;  %s2493_s30 = smov 0  }
  0x18   :  { %s2495_s0 = smov 0   ;;  %s2497_s19 = smov 0  }
  0x19 LB: > { %2877 = sst [smem:[#allocation18_spill]] %s2356_s28  ;;  %s2853_s2 = sadd.s32 4294967295, %s2372_s19   ;;  %s2372_s19 = sphi %s2497_s19, %s34_s19   ;;  %s2368_s0 = sphi %s2495_s0, %s2917_s0   ;;  %s2364_s30 = sphi %s2493_s30, %s2916_s30   ;;  %s2360_s29 = sphi %s2491_s29, %s2915_s29   ;;  %s2356_s28 = sphi %s2489_s28, %s2914_s28   ;;  %s2352_s27 = sphi %s2487_s27, %s2913_s27  }
  0x1a   : > { %2878 = sst [smem:[#allocation19_spill]] %s2360_s29  ;;  %p1859_p0 = scmp.ge.s32.totalorder %s2372_s19, 1 }
  0x1b   : > { %2879 = sst [smem:[#allocation20_spill]] %s2368_s0  ;;  %p2524_p1 = scmp.eq.s32.totalorder %s2853_s2, 0 }
  0x1c   : > { %s2880_s21 = sld [smem:[#allocation24_spill]]  ;;  %p525_p2 = scmp.lt.s32.totalorder %s2372_s19, 3 }
  0x1d   : > { %s2374_s25 = smov [#allocation6]   ;;  %s2375_s20 = smov 16  }
  0x1e   : > { %p2529_p3 = pnand %p1859_p0, %p525_p2  ;;  %s557_s26 = sshll.u32 %s2374_s25, 4  ;;  %s558_s26 = int_to_ptr.vmem [resolvable:$true] %s557_s26 }
  0x1f   : > { %s43_s25 = sadd.s32 1, %s2368_s0  ;;  %s277_s2 = sadd.s32 1, %s2360_s29 }
  0x20   : > { %p1986_p4 = pneg %p2529_p3  ;;  %p44_p6 = scmp.ge.s32.totalorder %s43_s25, 2 }
  0x21   : > { %p284_p7 = scmp.ne.s32.totalorder %s2360_s29, %s2356_s28  ;;  %p285_p8 = scmp.eq.s32.totalorder %s2372_s19, 0 }
  0x22   : > { %s555_s22 = sshll.u32 %s2880_s21, 4  ;;  %p2537_p5 = pnand %p1986_p4, %p2524_p1  ;;  %s556_s22 = int_to_ptr.hbm [resolvable:$true] %s555_s22 }
  0x23   : > { %s2376_s21 = smov 1   ;;  %s2919_s25 = smov (%p44_p6, %s43_s25), 0 }
  0x24   : > { %1992 = dma.hbm_to_vmem [thread:$0]  (!%p2537_p5), %s556_s22, 32, %s558_s26, [#allocation7], %s2375_s20, %s2375_s20, %s2376_s21  }
  0x25   : > { %2884 = sst [smem:[#allocation21_spill]] %s2919_s25  ;;  %p2550_p9 = por %p285_p8, %p284_p7 }
  0x26   : > { %p290_p10 = scmp.ne.s32.totalorder %s2356_s28, %s2352_s27  ;;  %s274_s17 = ssub.s32 %s2368_s0, %s2919_s25 }
  0x27   : > { %p2010_p11 = scmp.lt.s32.totalorder %s2372_s19, 2  ;;  %p275_p12 = scmp.eq.s32.totalorder %s274_s17, 0 }
  0x28   : > { %p2561_p13 = por %p2524_p1, %p290_p10  ;;  %s637_s26 = sand.u32 1, %s2372_s19  }
  0x29   : > { %s2856_s20 = sand.u32 1, %s2360_s29   ;;  %s2888_s9 = sld [smem:[#allocation30_spill]] }
  0x2a   : > { %s2568_s21 = scalar_select %p275_p12, %s2360_s29, %s277_s2  }
  0x2b   : > { %s640_s11 = scalar_lea.vmem [#allocation9], %s2856_s20  ;;  %p2578_p0 = pnand %p2010_p11, %p2550_p9 }
  0x2c   : > { %2887 = sst [smem:[#allocation22_spill]] %s2568_s21  ;;  %s647_s27 = sshll.u32 %s640_s11, 4  ;;  %s648_s27 = int_to_ptr.vmem [resolvable:$true] %s647_s27 }
  0x2d   : > { %s2582_s10 = scalar_lea.sflag [#allocation10], %s637_s26  ;;  %s2890_s2 = sld [smem:[#allocation23_spill]] }
  0x2e   : > { %s2377_s11 = smov [#allocation4]   ;;  %s2891_s3 = sld [smem:[#allocation26_spill]] }
  0x2f   : > { %s643_s13 = scalar_lea.hbm %s2888_s9, %s2368_s0  ;;  %s2378_s8 = smov 128  }
  0x30   : > { %s645_s25 = sshll.u32 %s643_s13, 4  ;;  %s541_s13 = sshll.u32 %s2377_s11, 4  ;;  %s646_s25 = int_to_ptr.hbm [resolvable:$true] %s645_s25  ;;  %s542_s13 = int_to_ptr.vmem [resolvable:$true] %s541_s13 }
  0x31   : > { %2002 = dma.hbm_to_vmem [thread:$0]  (!%p2578_p0), %s646_s25, 16, %s648_s27, %s2582_s10  }
  0x32   : > { %s2379_s26 = smov 8   ;;  %s2380_s25 = smov [#allocation8]  }
  0x33   : > { %s539_s20 = sshll.u32 %s2890_s2, 4  ;;  %s575_s27 = sshll.u32 %s2380_s25, 4  ;;  %s540_s20 = int_to_ptr.hbm [resolvable:$true] %s539_s20  ;;  %s576_s27 = int_to_ptr.vmem [resolvable:$true] %s575_s27 }
  0x34   : > { %s573_s21 = sshll.u32 %s2891_s3, 4  ;;  %s2892_s16 = sld [smem:[#allocation37_spill]]  ;;  %s574_s21 = int_to_ptr.hbm [resolvable:$true] %s573_s21 }
  0x35   : > { %1989 = dma.hbm_to_vmem [thread:$0]  (!%p2537_p5), %s540_s20, 256, %s542_s13, [#allocation5], %s2378_s8, %s2378_s8, %s2379_s26  }
  0x36   : > { %1995 = dma.hbm_to_vmem [thread:$0]  (!%p2537_p5), %s574_s21, 16, %s576_s27, [#allocation7]  }
  0x37   : > { %s2381_s9 = smov [#allocation12]   ;;  %s2893_s15 = sld [smem:[#allocation36_spill]] }
  0x38   : > { %s586_s11 = sshll.u32 %s2381_s9, 4  ;;  %s2382_s20 = smov 64   ;;  %s587_s11 = int_to_ptr.vmem [resolvable:$true] %s586_s11 }
  0x39   : > { %s2383_s13 = smov 4   ;;  %s2894_s25 = sand.u32 1, %s2360_s29  }
  0x3a   : > { %s584_s2 = sshll.u32 %s2892_s16, 4  ;;  %s691_s12 = scalar_lea.vmem [#allocation11], %s2894_s25  ;;  %s585_s2 = int_to_ptr.hbm [resolvable:$true] %s584_s2 }
  0x3b   : > { %1998 = dma.hbm_to_vmem [thread:$0]  (!%p2537_p5), %s585_s2, 256, %s587_s11, [#allocation13], %s2382_s20, %s2382_s20, %s2383_s13  }
  0x3c   : > { %s698_s14 = sshll.u32 %s691_s12, 4  ;;  %707 = sbr.rel (%p2529_p3) target bundleno = 2794 (0xaea), region = 92  ;;  %s699_s14 = int_to_ptr.vmem [resolvable:$true] %s698_s14 }
  0x3d   : > { %s694_s8 = scalar_lea.hbm %s2893_s15, %s2368_s0 }
  0x3e   : > { %s696_s26 = sshll.u32 %s694_s8, 4  ;;  %s697_s26 = int_to_ptr.hbm [resolvable:$true] %s696_s26 }
  0x3f   : > { %2005 = dma.hbm_to_vmem [thread:$0]  (!%p2578_p0), %s697_s26, 16, %s699_s14, %s2582_s10  }
  0x41   : > { %2335 = dma.done.wait (%p2524_p1), [#allocation5], 256  }
  0x42   : > { %2337 = vsyncadd (%p2524_p1), [#allocation5], 4294967040 }
  0x43   : > { %2339 = dma.done.wait (%p2524_p1), [#allocation7], 48  }
  0x44   : > { %2341 = vsyncadd (%p2524_p1), [#allocation7], 4294967248  ;;  %s2895_s3 = sadd.s32 4294967295, %s2372_s19   ;;  %s726_s1 = sand.u32 1, %s2356_s28  }
  0x45   : > { %s724_s10 = sand.u32 1, %s2895_s3   ;;  %s2624_s21 = scalar_lea.vmem [#allocation9], %s726_s1 }
  0x46   : > { %s725_s24 = scalar_lea.sflag [#allocation10], %s724_s10 }
  0x47   : > { %2343 = dma.done.wait (%p2561_p13), %s725_s24, 32  }
  0x48   : > { %2345 = vsyncadd (%p2561_p13), %s725_s24, 4294967264  ;;  %s2630_s17 = scalar_lea.vmem [#allocation11], %s726_s1 }
  0x49   : > { %2347 = dma.done.wait (%p2524_p1), [#allocation13], 256  }
  0x4a   : > { %2349 = vsyncadd (%p2524_p1), [#allocation13], 4294967040  ;;  %p838_p2 = scmp.lt.s32.totalorder %s2364_s30, 1  ;;  %s2896_s4 = sld [smem:[#allocation27_spill]] }
  0x4b   : > { %s2897_s6 = sld [smem:[#allocation28_spill]]  ;;  %p1878_p1 = scmp.ne.s32.totalorder %s2364_s30, 0 }
  0x4c   : > { %s2638_s27 = scalar_select %p838_p2, %s2364_s30, 1 }
  0x4d   : > { %s2898_s1 = sld [smem:[#allocation29_spill]] }
  0x4e   : > { %s1949_s22 = sshll.u32 %s2638_s27, 4  ;;  %s2899_s11 = sld [smem:[#allocation31_spill]] }
  0x4f   : > { %s1952_s20 = sshll.u32 %s2638_s27, 5  ;;  %s2901_s0 = sld [smem:[#allocation34_spill]] }
  0x50   : > { %s2648_s8 = scalar_lea.vmem %s2896_s4, %s1949_s22  ;;  %s2900_s4 = sld [smem:[#allocation32_spill]] }
  0x51   : > { %s2653_s26 = scalar_lea.vmem %s2897_s6, %s1949_s22  ;;  %s2902_s14 = sld [smem:[#allocation33_spill]] }
  0x53   : > { %s856_s24 = scalar_lea.vmem %s2898_s1, %s2638_s27  ;;  %s2903_s1 = sld [smem:[#allocation35_spill]] }
  0x54   : > { %s2666_s15 = scalar_lea.vmem %s2899_s11, %s1949_s22 }
  0x55   : > { %s872_s29 = scalar_lea.vmem %s2901_s0, %s2638_s27  ;;  %886 = sbr.rel (%p1878_p1) target bundleno = 368 (0x170), region = 120 }
  0x56   : > { %s864_s16 = scalar_lea.vmem %s2900_s4, %s2638_s27  ;;  %s2904_s0 = sld [smem:[#allocation25_spill]] (!%p1878_p1) }
  0x57   : > { %s2680_s28 = scalar_lea.vmem %s2902_s14, %s1952_s20 }
  0x59   : > { %s875_s2 = scalar_lea.vmem %s2903_s1, %s2638_s27 }
  0x5a   : > { %v887_v0 = vld [vmem:[#allocation4] sm:$0xff]  ;;  %vm891_vm0 = vcmask 261120   ;;  %v888_v2 = vld [vmem:[#allocation4 + $0x8] sm:$0xff]  ;;  %v2384_v4 = vmov 32.0   ;;  %v2082_v38 = vld [vmem:[#allocation8] ss:$0 sm:$0xff] }
  0x5b   : > { %v892_v1 = vsel %vm891_vm0, %v887_v0, 0.0  ;;  %v895_v3 = vsel %vm891_vm0, %v888_v2, 0.0  ;;  %2083 = vrcp.f32 %v2384_v4 }
  0x5c   : > { %893 = vadd.xlane.f32.xlu0 %v892_v1  ;;  %v2081_v35 = vld [vmem:[%s2904_s0] ss:$0 sm:$0xff] }
  0x61   : > { %v2084_v5 = vpop.eup %2083 }
  0x62   : > { %v899_v6 = vmul.f32 32.0, %v2084_v5  ;;  %vm903_vm1 = vweird.f32 %v2084_v5 }
  0x64   : > { %896 = vadd.xlane.f32.xlu0 %v895_v3  ;;  %v900_v7 = vsub.f32 1.0, %v899_v6 }
  0x66   : > { %v901_v8 = vmul.f32 %v2084_v5, %v900_v7 }
  0x68   : > { %v902_v9 = vadd.f32 %v2084_v5, %v901_v8 }
  0x6a   : > { %v904_v10 = vsel %vm903_vm1, %v2084_v5, %v902_v9 }
  0xcf   : > { %v894_v11 = vpop.xlane.xlu0 %893 }
  0xd0   : > { %v905_v12 = vmul.f32 %v904_v10, %v894_v11 }
  0xd2   : > { %v907_v13 = vsub.f32 %v887_v0, %v905_v12 }
  0xd4   : > { %v909_v14 = vmul.f32 %v907_v13, %v907_v13 }
  0xd6   : > { %v911_v15 = vsel %vm891_vm0, %v909_v14, 0.0 }
  0xd7   : > { %912 = vadd.xlane.f32.xlu1 %v911_v15  ;;  %v897_v16 = vpop.xlane.xlu0 %896 }
  0xd8   : > { %v906_v17 = vmul.f32 %v904_v10, %v897_v16 }
  0xda   : > { %v908_v18 = vsub.f32 %v888_v2, %v906_v17 }
  0xdc   : > { %v910_v19 = vmul.f32 %v908_v18, %v908_v18 }
  0xde   : > { %v914_v20 = vsel %vm891_vm0, %v910_v19, 0.0 }
  0xdf   : > { %915 = vadd.xlane.f32.xlu1 %v914_v20 }
 0x14a   : > { %v913_v21 = vpop.xlane.xlu1 %912 }
 0x14b   : > { %v917_v22 = vmul.f32 %v913_v21, %v904_v10 }
 0x14d   : > { %v919_v23 = vadd.f32 1e-12, %v917_v22 }
 0x14f   : > { %2085 = vrsqrt.f32 %v919_v23  ;;  %vm927_vm3 = vweird.f32 %v919_v23 }
 0x152   : > { %v916_v24 = vpop.xlane.xlu1 %915 }
 0x153   : > { %v918_v25 = vmul.f32 %v916_v24, %v904_v10 }
 0x155   : > { %v2086_v26 = vpop.eup %2085  ;;  %v920_v27 = vadd.f32 1e-12, %v918_v25 }
 0x156   : > { %v922_v28 = vmul.f32 %v2086_v26, %v919_v23  ;;  %vm928_vm2 = vweird.f32 %v2086_v26 }
 0x157   : > { %2087 = vrsqrt.f32 %v920_v27  ;;  %vm929_vm4 = vmor %vm927_vm3, %vm928_vm2  ;;  %vm937_vm6 = vweird.f32 %v920_v27 }
 0x158   : > { %v923_v29 = vmul.f32 %v2086_v26, %v922_v28 }
 0x15a   : > { %v924_v30 = vmul.f32 0.5, %v923_v29 }
 0x15c   : > { %v925_v31 = vsub.f32 1.5, %v924_v30 }
 0x15d   : > { %v2088_v32 = vpop.eup %2087 }
 0x15e   : > { %v926_v33 = vmul.f32 %v2086_v26, %v925_v31  ;;  %v932_v34 = vmul.f32 %v2088_v32, %v920_v27  ;;  %vm938_vm5 = vweird.f32 %v2088_v32 }
 0x15f   : > { %vm939_vm7 = vmor %vm937_vm6, %vm938_vm5 }
 0x160   : > { %v930_v36 = vsel %vm929_vm4, %v2086_v26, %v926_v33  ;;  %v933_v37 = vmul.f32 %v2088_v32, %v932_v34 }
 0x161   : > { %v941_v39 = vmul.f32 %v930_v36, %v907_v13 }
 0x162   : > { %v934_v40 = vmul.f32 0.5, %v933_v37 }
 0x163   : > { %v946_v41 = vmul.f32 %v2081_v35, %v941_v39 }
 0x164   : > { %v935_v42 = vsub.f32 1.5, %v934_v40 }
 0x165   : > { %v951_v43 = vadd.f32 %v2082_v38, %v946_v41 }
 0x166   : > { %v936_v44 = vmul.f32 %v2088_v32, %v935_v42 }
 0x167   : > { %953 = vst.msk [vmem:[#allocation2] sm:$0xff] %vm891_vm0, %v951_v43 }
 0x168   : > { %v940_v45 = vsel %vm939_vm7, %v2088_v32, %v936_v44 }
 0x169   : > { %v942_v46 = vmul.f32 %v940_v45, %v908_v18 }
 0x16b   : > { %v947_v47 = vmul.f32 %v2081_v35, %v942_v46 }
 0x16d   : > { %v952_v48 = vadd.f32 %v2082_v38, %v947_v47 }
 0x16f   : > { %954 = vst.msk [vmem:[#allocation2 + $0x8] sm:$0xff] %vm891_vm0, %v952_v48 }
 0x170 PF: > { %v1954_v49 = vld [vmem:[%s2648_s8 + $0x8] sm:$0xff]  ;;  %v1953_v50 = vld [vmem:[%s2648_s8] sm:$0xff]  ;;  %vm978_vm8 = vcmask 261120   ;;  %s2905_s14 = scalar_lea.vmem %s2839_s5, %s2638_s27  ;;  %s2385_s8 = smov 80   ;;  %vm1015_vm9 = vcmask 130048   ;;  %vm1059_vm10 = vcmask 64512  }
 0x171   : > { %v2698_v51 = vld [vmem:[#allocation2] sm:$0xff]  ;;  %988 = vmatpush.bf16.msra.mxu0 %v1954_v49  ;;  %s2386_s9 = smov 96   ;;  %s2387_s23 = smov 112   ;;  %v2090_v19 = vld [vmem:[#allocation6] ss:$0 sm:$0xff]  ;;  %vm1089_vm11 = vcmask 1043456  }
 0x172   : > { %v2089_v54 = vld [vmem:[%s2905_s14] ss:$0 sm:$0xff]  ;;  %v2091_v28 = vld [vmem:[#allocation6 + $0x1] ss:$0 sm:$0xff]  ;;  %s2388_s18 = smov 64   ;;  %s2389_s20 = smov 48  }
 0x173   : > { %vm1129_vm12 = vcmask 125952   ;;  %s2390_s13 = smov 16   ;;  %vm1260_vm13 = vcmask 257152   ;;  %s2906_s3 = scalar_lea.vmem %s2841_s7, %s2638_s27  ;;  %vm1465_vm5 = vcmask 523264  }
 0x174   : > { %p1935_p3 = scmp.ne.s32.totalorder %s2364_s30, 1 }
 0x175   : > { %989 = vmatpush.bf16.msra.mxu0 %v1953_v50  ;;  %s2912_s11 = sld [smem:[#allocation39_spill]] (!%p1935_p3) }
 0x176   : > { %v2700_v52 = vld [vmem:[#allocation2 + $0x8] sm:$0xff] }
 0x177   : > { %v957_v53 = vpack.c.bf16 %v2700_v52, %v2698_v51 }
 0x179   : > { %1887 = vmatmul.msk.bf16.vlgmr.msra.gmra.mxu0 %vm978_vm8, %v957_v53 }
 0x1f6   : > { %v991_v55 = vpop.f32.mrf.mxu0 }
 0x1f7   : > { %v992_v56 = vadd.f32 %v2089_v54, %v991_v55 }
 0x1f9   : > { %v996_v57 = vmul.f32 0.25, %v992_v56  ;;  %v1000_v58 = vpack.c.bf16 %v992_v56, %v992_v56 }
 0x1fb   : > { %v998_v59 = vpack.c.bf16 %v996_v57, %v996_v57  ;;  %v1011_v60 = vunpack.c.l.b16 %v1000_v58 }
 0x1fd   : > { %v2710_v61 = vpack.c.b16 %v1011_v60, %v1011_v60  ;;  %v1133_v62 = vunpack.c.l.b16 %v998_v59 }
 0x1fe   : > { %v993_v63 = vpop.f32.mrf.mxu0 }
 0x1ff   : > { %v994_v0 = vadd.f32 %v2089_v54, %v993_v63  ;;  %1137 = vrot.lane.b32.xlu1 %v2710_v61, %s2385_s8  ;;  %1013 = vrot.lane.b32.xlu0 %v2710_v61, %s2386_s9  ;;  %v1134_v1 = vpack.c.b16 %v1133_v62, %v1133_v62 }
 0x201   : > { %v997_v2 = vmul.f32 0.25, %v994_v0  ;;  %v1001_v3 = vpack.c.bf16 %v994_v0, %v994_v0  ;;  %1135 = vrot.lane.b32.xlu2 %v1134_v1, %s2387_s23 }
 0x203   : > { %v999_v4 = vpack.c.bf16 %v997_v2, %v997_v2  ;;  %v1036_v5 = vunpack.c.l.b16 %v1001_v3 }
 0x205   : > { %v2714_v6 = vpack.c.b16 %v1036_v5, %v1036_v5  ;;  %v1159_v7 = vunpack.c.l.b16 %v999_v4 }
 0x207   : > { %1163 = vrot.lane.b32.xlu1 %v2714_v6, %s2385_s8  ;;  %1038 = vrot.lane.b32.xlu0 %v2714_v6, %s2386_s9  ;;  %v1160_v8 = vpack.c.b16 %v1159_v7, %v1159_v7 }
 0x209   : > { %1161 = vrot.lane.b32.xlu2 %v1160_v8, %s2387_s23 }
 0x25b   : > { %v1136_v13 = vpop.permute.xlu2 %1135 }
 0x263   : > { %v1162_v18 = vpop.permute.xlu2 %1161 }
 0x271   : > { %v1138_v9 = vpop.permute.xlu1 %1137  ;;  %v1014_v10 = vpop.permute.xlu0 %1013 }
 0x272   : > { %v1020_v11 = vsel %vm1015_vm9, %v1014_v10, 0  ;;  %v1143_v12 = vsel %vm1015_vm9, %v1138_v9, 0 }
 0x273   : > { %1029 = vmatpush.bf16.xpose.msra.mxu1 %v1020_v11  ;;  %1152 = vmatpush.bf16.xpose.msrb.mxu0 %v1143_v12 }
 0x279   : > { %v1164_v14 = vpop.permute.xlu1 %1163  ;;  %v1039_v15 = vpop.permute.xlu0 %1038 }
 0x27a   : > { %1888 = vmatmul.msk.bf16.vlgmr.msra.gmra.mxu1 %vm1015_vm9, %v998_v59  ;;  %1892 = vmatmul.msk.bf16.vlgmr.msrb.gmra.mxu0 %vm1015_vm9, %v1136_v13  ;;  %v1044_v16 = vsel %vm1015_vm9, %v1039_v15, 0  ;;  %v1169_v17 = vsel %vm1015_vm9, %v1164_v14, 0 }
 0x27b   : > { %1053 = vmatpush.bf16.xpose.msra.mxu2 %v1044_v16  ;;  %1178 = vmatpush.bf16.xpose.msrb.mxu1 %v1169_v17 }
 0x282   : > { %1889 = vmatmul.msk.bf16.vlgmr.msra.gmra.mxu2 %vm1015_vm9, %v999_v4 }
 0x28a   : > { %1893 = vmatmul.msk.bf16.vlgmr.msrb.gmra.mxu1 %vm1015_vm9, %v1162_v18 }
 0x2f7   : > { %v1031_v20 = vpop.f32.mrf.mxu1  ;;  %v1154_v21 = vpop.f32.mrf.mxu0 }
 0x2f8   : > { %v1032_v22 = vadd.f32 %v2090_v19, %v1031_v20  ;;  %v1155_v23 = vadd.f32 %v2090_v19, %v1154_v21 }
 0x2fa   : > { %v1184_v24 = vsel %vm1059_vm10, %v1155_v23, -inf  ;;  %v1060_v25 = vsel %vm1059_vm10, %v1032_v22, -inf }
 0x2fb   : > { %1185 = vmax.xlane.f32.xlu2 %v1184_v24  ;;  %1061 = vmax.xlane.f32.xlu0 %v1060_v25 }
 0x2ff   : > { %v1033_v26 = vpop.f32.mrf.mxu1  ;;  %v1156_v27 = vpop.f32.mrf.mxu0 }
 0x305   : > { %v1055_v29 = vpop.f32.mrf.mxu2 }
 0x306   : > { %v1056_v30 = vadd.f32 %v2091_v28, %v1055_v29 }
 0x307   : > { %v1180_v31 = vpop.f32.mrf.mxu1 }
 0x308   : > { %v1181_v32 = vadd.f32 %v2091_v28, %v1180_v31  ;;  %v1063_v33 = vsel %vm1059_vm10, %v1056_v30, -inf  ;;  %v1957_v31 = vld [vmem:[%s2653_s26 + $0x8] sm:$0xff] }
 0x309   : > { %1064 = vmax.xlane.f32.xlu1 %v1063_v33  ;;  %1299 = vmatpush.bf16.msra.mxu0 %v1957_v31  ;;  %v1956_v33 = vld [vmem:[%s2653_s26] sm:$0xff]  ;;  %v1961_v31 = vld [vmem:[%s2680_s28 + $0x8] sm:$0xff] }
 0x30a   : > { %v1187_v34 = vsel %vm1059_vm10, %v1181_v32, -inf }
 0x30b   : > { %1188 = vmax.xlane.f32.xlu2 %v1187_v34 }
 0x30d   : > { %v1057_v35 = vpop.f32.mrf.mxu2  ;;  %1300 = vmatpush.bf16.msra.mxu0 %v1956_v33  ;;  %v1960_v33 = vld [vmem:[%s2680_s28] sm:$0xff] }
 0x30f   : > { %v1182_v36 = vpop.f32.mrf.mxu1  ;;  %1106 = vrot.lane.b32.xlu0 %v2714_v6, %s2388_s18 }
 0x310   : > { %v2092_v36 = vld [vmem:[%s2906_s3] ss:$0 sm:$0xff] }
 0x322   : > { %1084 = vrot.lane.b32.xlu1 %v2710_v61, %s2388_s18 }
 0x32a   : > { %1208 = vrot.lane.b32.xlu1 %v2710_v61, %s2389_s20 }
 0x36e   : > { %v1062_v37 = vpop.xlane.xlu0 %1061  ;;  %v1186_v42 = vpop.xlane.xlu2 %1185 }
 0x36f   : > { %v1066_v38 = vsub.f32 %v1032_v22, %v1062_v37  ;;  %v1190_v45 = vsub.f32 %v1155_v23, %v1186_v42 }
 0x371   : > { %v1068_v39 = vmul.f32 1.442695, %v1066_v38  ;;  %v1192_v47 = vmul.f32 1.442695, %v1190_v45  ;;  %v2391_v45 = vmov 32.0  }
 0x373   : > { %2099 = vpow2.f32 %v1068_v39 }
 0x379   : > { %v2100_v40 = vpop.eup %2099 }
 0x37a   : > { %v1072_v41 = vsel %vm1059_vm10, %v2100_v40, 0.0 }
 0x37b   : > { %1073 = vadd.xlane.f32.xlu0 %v1072_v41 }
 0x37c   : > { %v1065_v43 = vpop.xlane.xlu1 %1064 }
 0x37d   : > { %v1067_v44 = vsub.f32 %v1056_v30, %v1065_v43 }
 0x37e   : > { %v1189_v48 = vpop.xlane.xlu2 %1188 }
 0x37f   : > { %v1070_v46 = vmul.f32 1.442695, %v1067_v44  ;;  %v1191_v50 = vsub.f32 %v1181_v32, %v1189_v48 }
 0x381   : > { %2101 = vpow2.f32 %v1070_v46  ;;  %v1194_v54 = vmul.f32 1.442695, %v1191_v50  ;;  %v1107_v57 = vpop.permute.xlu0 %1106 }
 0x382   : > { %2103 = vpow2.f32 %v1192_v47  ;;  %v1112_v61 = vsel %vm1089_vm11, %v1107_v57, 0 }
 0x383   : > { %2105 = vpow2.f32 %v1194_v54 }
 0x387   : > { %v2102_v49 = vpop.eup %2101 }
 0x388   : > { %v1075_v53 = vsel %vm1059_vm10, %v2102_v49, 0.0  ;;  %v2104_v55 = vpop.eup %2103 }
 0x389   : > { %1076 = vadd.xlane.f32.xlu2 %v1075_v53  ;;  %v1196_v56 = vsel %vm1059_vm10, %v2104_v55, 0.0  ;;  %v2106_v59 = vpop.eup %2105 }
 0x38a   : > { %v1199_v62 = vsel %vm1059_vm10, %v2106_v59, 0.0 }
 0x38f   : > { %1229 = vrot.lane.b32.xlu0 %v2714_v6, %s2389_s20 }
 0x391   : > { %1197 = vadd.xlane.f32.xlu2 %v1196_v56 }
 0x394   : > { %v1085_v58 = vpop.permute.xlu1 %1084 }
 0x395   : > { %v1091_v60 = vsel %vm1089_vm11, %v1085_v58, 0 }
 0x396   : > { %1100 = vmatpush.bf16.msra.mxu3 %v1091_v60 }
 0x399   : > { %1200 = vadd.xlane.f32.xlu2 %v1199_v62  ;;  %v1959_v62 = vld [vmem:[%s2666_s15 + $0x8] sm:$0xff] }
 0x39a   : > { %1121 = vmatpush.bf16.msrb.mxu3 %v1112_v61  ;;  %1402 = vmatpush.bf16.msra.mxu1 %v1959_v62 }
 0x39c   : > { %v1209_v63 = vpop.permute.xlu1 %1208 }
 0x39d   : > { %v1214_v0 = vsel %vm1089_vm11, %v1209_v63, 0 }
 0x39e   : > { %1223 = vmatpush.bf16.msrb.mxu2 %v1214_v0 }
 0x3ee   : > { %v1074_v1 = vpop.xlane.xlu0 %1073 }
 0x3ef   : > { %2107 = vrcp.f32 %v1074_v1  ;;  %v1958_v1 = vld [vmem:[%s2666_s15] sm:$0xff] }
 0x3f0   : > { %1403 = vmatpush.bf16.msra.mxu1 %v1958_v1 }
 0x3f5   : > { %v2108_v2 = vpop.eup %2107 }
 0x3f6   : > { %v1080_v3 = vmul.f32 %v2108_v2, %v2100_v40 }
 0x3f8   : > { %v1082_v4 = vpack.c.bf16 %v1080_v3, %v1080_v3 }
 0x3fa   : > { %1890 = vmatmul.msk.bf16.vlgmr.msra.gmra.mxu3 %vm1059_vm10, %v1082_v4 }
 0x3fc   : > { %v1077_v5 = vpop.xlane.xlu2 %1076 }
 0x3fd   : > { %2109 = vrcp.f32 %v1077_v5 }
 0x401   : > { %v1230_v6 = vpop.permute.xlu0 %1229 }
 0x402   : > { %v1235_v8 = vsel %vm1089_vm11, %v1230_v6, 0 }
 0x403   : > { %v2110_v7 = vpop.eup %2109  ;;  %1244 = vmatpush.bf16.msra.mxu3 %v1235_v8 }
 0x404   : > { %v1198_v9 = vpop.xlane.xlu2 %1197  ;;  %v1081_v10 = vmul.f32 %v2110_v7, %v2102_v49 }
 0x405   : > { %2111 = vrcp.f32 %v1198_v9 }
 0x406   : > { %v1083_v11 = vpack.c.bf16 %v1081_v10, %v1081_v10 }
 0x40a   : > { %1891 = vmatmul.msk.bf16.vlgmr.msrb.gmra.mxu3 %vm1059_vm10, %v1083_v11 }
 0x40b   : > { %v2112_v12 = vpop.eup %2111 }
 0x40c   : > { %v1204_v13 = vmul.f32 %v2112_v12, %v2104_v55  ;;  %v1201_v14 = vpop.xlane.xlu2 %1200 }
 0x40d   : > { %2113 = vrcp.f32 %v1201_v14 }
 0x40e   : > { %v1206_v15 = vpack.c.bf16 %v1204_v13, %v1204_v13  ;;  %2115 = vrcp.f32 %v2391_v45 }
 0x410   : > { %1894 = vmatmul.msk.bf16.vlgmr.msrb.gmra.mxu2 %vm1059_vm10, %v1206_v15 }
 0x413   : > { %v2114_v16 = vpop.eup %2113 }
 0x414   : > { %v1205_v17 = vmul.f32 %v2114_v16, %v2106_v59  ;;  %v2116_v46 = vpop.eup %2115 }
 0x415   : > { %v1318_v47 = vmul.f32 32.0, %v2116_v46  ;;  %vm1322_vm14 = vweird.f32 %v2116_v46 }
 0x416   : > { %v1207_v18 = vpack.c.bf16 %v1205_v17, %v1205_v17 }
 0x417   : > { %v1319_v48 = vsub.f32 1.0, %v1318_v47 }
 0x419   : > { %v1320_v49 = vmul.f32 %v2116_v46, %v1319_v48 }
 0x41a   : > { %1895 = vmatmul.msk.bf16.vlgmr.msra.gmra.mxu3 %vm1059_vm10, %v1207_v18  ;;  %v2093_v18 = vld [vmem:[%s856_s24] ss:$0 sm:$0xff] }
 0x41b   : > { %v1321_v50 = vadd.f32 %v2116_v46, %v1320_v49 }
 0x47d   : > { %v1102_v19 = vpop.f32.mrf.mxu3 }
 0x47e   : > { %v1127_v20 = vpack.c.bf16 %v1102_v19, %v1102_v19 }
 0x480   : > { %1130 = vst.msk [vmem:[#allocation3] sm:$0xf] %vm1129_vm12, %v1127_v20 }
 0x485   : > { %v1104_v21 = vpop.f32.mrf.mxu3 }
 0x48d   : > { %v1123_v22 = vpop.f32.mrf.mxu3 }
 0x48e   : > { %v1128_v23 = vpack.c.bf16 %v1123_v22, %v1123_v22  ;;  %v2094_v22 = vld [vmem:[%s2624_s21] ss:$0 sm:$0xff] }
 0x490   : > { %1131 = vst.msk [vmem:[#allocation3 + $0x4] sm:$0xf] %vm1129_vm12, %v1128_v23 }
 0x493   : > { %v1225_v24 = vpop.f32.mrf.mxu2 }
 0x494   : > { %v1250_v25 = vpack.c.bf16 %v1225_v24, %v1225_v24 }
 0x495   : > { %v1125_v26 = vpop.f32.mrf.mxu3 }
 0x496   : > { %1254 = vrot.lane.b32.xlu2 %v1250_v25, %s2390_s13 }
 0x49b   : > { %v1227_v27 = vpop.f32.mrf.mxu2 }
 0x49d   : > { %v1246_v28 = vpop.f32.mrf.mxu3 }
 0x49e   : > { %v1251_v29 = vpack.c.bf16 %v1246_v28, %v1246_v28 }
 0x4a0   : > { %1256 = vrot.lane.b32.xlu1 %v1251_v29, %s2390_s13  ;;  %v1963_v29 = vld [vmem:[%s2680_s28 + $0x18] sm:$0xff] }
 0x4a1   : > { %1473 = vmatpush.bf16.msra.mxu2 %v1963_v29  ;;  %v2098_v29 = vld [vmem:[%s2630_s17] ss:$0 sm:$0xff] }
 0x4a5   : > { %v1248_v30 = vpop.f32.mrf.mxu3 }
 0x4a6   : > { %v1962_v30 = vld [vmem:[%s2680_s28 + $0x10] sm:$0xff] }
 0x4a7   : > { %1474 = vmatpush.bf16.msra.mxu2 %v1962_v30 }
 0x4ab   : > { %1475 = vmatpush.bf16.msra.mxu2 %v1961_v31 }
 0x4af   : > { %1476 = vmatpush.bf16.msra.mxu2 %v1960_v33 }
 0x4f0   : > { %v1255_v32 = vpop.permute.xlu2 %1254 }
 0x4f1   : > { %1261 = vst.msk [vmem:[#allocation3] sm:$0xf] %vm1260_vm13, %v1255_v32  ;;  %v2095_v32 = vld [vmem:[%s864_s16] ss:$0 sm:$0xff] }
 0x512   : > { %v1257_v34 = vpop.permute.xlu1 %1256 }
 0x513   : > { %1262 = vst.msk [vmem:[#allocation3 + $0x4] sm:$0xf] %vm1260_vm13, %v1257_v34 }
 0x51a   : > { %v1955_v35 = vld [vmem:[#allocation3] sm:$0xff] }
 0x51b   : > { %1908 = vmatmul.msk.bf16.vlgmr.msra.gmra.mxu0 %vm978_vm8, %v1955_v35 }
 0x598   : > { %v1302_v37 = vpop.f32.mrf.mxu0 }
 0x599   : > { %v1303_v38 = vadd.f32 %v2092_v36, %v1302_v37 }
 0x59b   : > { %v1307_v39 = vadd.f32 %v1303_v38, %v2698_v51  ;;  %v2758_v51 = vsel %vm1322_vm14, %v2116_v46, %v1321_v50 }
 0x59d   : > { %v1311_v40 = vsel %vm978_vm8, %v1307_v39, 0.0 }
 0x59e   : > { %1312 = vadd.xlane.f32.xlu0 %v1311_v40 }
 0x5a0   : > { %v1304_v41 = vpop.f32.mrf.mxu0 }
 0x5a1   : > { %v1305_v42 = vadd.f32 %v2092_v36, %v1304_v41 }
 0x5a3   : > { %v1308_v43 = vadd.f32 %v1305_v42, %v2700_v52 }
 0x5a5   : > { %v1314_v44 = vsel %vm978_vm8, %v1308_v43, 0.0 }
 0x5a6   : > { %1315 = vadd.xlane.f32.xlu1 %v1314_v44 }
 0x611   : > { %v1313_v53 = vpop.xlane.xlu0 %1312 }
 0x612   : > { %v1324_v54 = vmul.f32 %v2758_v51, %v1313_v53 }
 0x614   : > { %v1326_v55 = vsub.f32 %v1307_v39, %v1324_v54 }
 0x616   : > { %v1328_v52 = vmul.f32 %v1326_v55, %v1326_v55 }
 0x618   : > { %v1330_v56 = vsel %vm978_vm8, %v1328_v52, 0.0 }
 0x619   : > { %v1316_v57 = vpop.xlane.xlu1 %1315  ;;  %1331 = vadd.xlane.f32.xlu2 %v1330_v56 }
 0x61a   : > { %v1325_v58 = vmul.f32 %v2758_v51, %v1316_v57 }
 0x61c   : > { %v1327_v59 = vsub.f32 %v1308_v43, %v1325_v58  ;;  %v2096_v58 = vld [vmem:[%s872_s29] ss:$0 sm:$0xff] }
 0x61e   : > { %v1329_v60 = vmul.f32 %v1327_v59, %v1327_v59 }
 0x620   : > { %v1333_v61 = vsel %vm978_vm8, %v1329_v60, 0.0 }
 0x621   : > { %1334 = vadd.xlane.f32.xlu0 %v1333_v61 }
 0x68c   : > { %v1332_v63 = vpop.xlane.xlu2 %1331 }
 0x68d   : > { %v1336_v0 = vmul.f32 %v1332_v63, %v2758_v51 }
 0x68f   : > { %v1338_v2 = vadd.f32 1e-12, %v1336_v0 }
 0x691   : > { %2117 = vrsqrt.f32 %v1338_v2  ;;  %vm1346_vm0 = vweird.f32 %v1338_v2 }
 0x694   : > { %v1335_v3 = vpop.xlane.xlu0 %1334 }
 0x695   : > { %v1337_v4 = vmul.f32 %v1335_v3, %v2758_v51 }
 0x697   : > { %v2118_v5 = vpop.eup %2117  ;;  %v1339_v6 = vadd.f32 1e-12, %v1337_v4 }
 0x698   : > { %v1341_v7 = vmul.f32 %v2118_v5, %v1338_v2  ;;  %vm1347_vm15 = vweird.f32 %v2118_v5 }
 0x699   : > { %2119 = vrsqrt.f32 %v1339_v6  ;;  %vm1348_vm1 = vmor %vm1346_vm0, %vm1347_vm15  ;;  %vm1356_vm3 = vweird.f32 %v1339_v6 }
 0x69a   : > { %v1342_v8 = vmul.f32 %v2118_v5, %v1341_v7 }
 0x69c   : > { %v1343_v9 = vmul.f32 0.5, %v1342_v8 }
 0x69e   : > { %v1344_v10 = vsub.f32 1.5, %v1343_v9 }
 0x69f   : > { %v2120_v11 = vpop.eup %2119 }
 0x6a0   : > { %v1345_v12 = vmul.f32 %v2118_v5, %v1344_v10  ;;  %v1351_v13 = vmul.f32 %v2120_v11, %v1339_v6  ;;  %vm1357_vm2 = vweird.f32 %v2120_v11 }
 0x6a1   : > { %vm1358_vm4 = vmor %vm1356_vm3, %vm1357_vm2 }
 0x6a2   : > { %v1352_v14 = vmul.f32 %v2120_v11, %v1351_v13  ;;  %v1349_v15 = vsel %vm1348_vm1, %v2118_v5, %v1345_v12 }
 0x6a3   : > { %v1360_v19 = vmul.f32 %v1349_v15, %v1326_v55 }
 0x6a4   : > { %v1353_v16 = vmul.f32 0.5, %v1352_v14 }
 0x6a5   : > { %v1365_v23 = vmul.f32 %v2093_v18, %v1360_v19 }
 0x6a6   : > { %v1354_v17 = vsub.f32 1.5, %v1353_v16 }
 0x6a7   : > { %v1370_v26 = vadd.f32 %v2094_v22, %v1365_v23 }
 0x6a8   : > { %v1355_v20 = vmul.f32 %v2120_v11, %v1354_v17 }
 0x6aa   : > { %v1359_v21 = vsel %vm1358_vm4, %v2120_v11, %v1355_v20 }
 0x6ab   : > { %v1361_v24 = vmul.f32 %v1359_v21, %v1327_v59 }
 0x6ad   : > { %v1366_v25 = vmul.f32 %v2093_v18, %v1361_v24 }
 0x6af   : > { %v1371_v27 = vadd.f32 %v2094_v22, %v1366_v25 }
 0x6b1   : > { %v1372_v28 = vpack.c.bf16 %v1371_v27, %v1370_v26 }
 0x6b3   : > { %1917 = vmatmul.msk.bf16.vlgmr.msra.gmra.mxu1 %vm978_vm8, %v1372_v28 }
 0x730   : > { %v1405_v34 = vpop.f32.mrf.mxu1 }
 0x731   : > { %v1406_v35 = vadd.f32 %v2095_v32, %v1405_v34 }
 0x733   : > { %v1410_v36 = vmul.f32 %v1406_v35, %v1406_v35 }
 0x735   : > { %v1412_v37 = vmul.f32 %v1410_v36, %v1406_v35 }
 0x737   : > { %v1414_v38 = vmul.f32 0.044715, %v1412_v37 }
 0x738   : > { %v1407_v39 = vpop.f32.mrf.mxu1 }
 0x739   : > { %v1416_v40 = vadd.f32 %v1414_v38, %v1406_v35  ;;  %v1408_v41 = vadd.f32 %v2095_v32, %v1407_v39 }
 0x73b   : > { %v1418_v42 = vmul.f32 0.7978846, %v1416_v40  ;;  %v1411_v43 = vmul.f32 %v1408_v41, %v1408_v41 }
 0x73d   : > { %v1413_v44 = vmul.f32 %v1411_v43, %v1408_v41  ;;  %2121 = vtanh.f32 %v1418_v42 }
 0x73f   : > { %v1415_v45 = vmul.f32 0.044715, %v1413_v44 }
 0x741   : > { %v1417_v46 = vadd.f32 %v1415_v45, %v1408_v41 }
 0x743   : > { %v1419_v47 = vmul.f32 0.7978846, %v1417_v46  ;;  %v2122_v48 = vpop.eup %2121 }
 0x744   : > { %v1422_v49 = vadd.f32 1.0, %v2122_v48 }
 0x745   : > { %2123 = vtanh.f32 %v1419_v47 }
 0x746   : > { %v1424_v53 = vmul.f32 0.5, %v1422_v49 }
 0x748   : > { %v1426_v52 = vmul.f32 %v1424_v53, %v1406_v35 }
 0x74b   : > { %v2124_v50 = vpop.eup %2123 }
 0x74c   : > { %v1423_v54 = vadd.f32 1.0, %v2124_v50 }
 0x74e   : > { %v1425_v55 = vmul.f32 0.5, %v1423_v54 }
 0x750   : > { %v1427_v56 = vmul.f32 %v1425_v55, %v1408_v41 }
 0x752   : > { %v1428_v57 = vpack.c.bf16 %v1427_v56, %v1426_v52 }
 0x754   : > { %1934 = vmatmul.msk.bf16.vlgmr.msra.gmra.mxu2 %vm1465_vm5, %v1428_v57 }
 0x7d7   : > { %v1478_v59 = vpop.f32.mrf.mxu2 }
 0x7d8   : > { %v1479_v60 = vadd.f32 %v2096_v58, %v1478_v59 }
 0x7da   : > { %v1483_v61 = vadd.f32 %v1479_v60, %v1370_v26 }
 0x7dc   : > { %v1487_v62 = vsel %vm978_vm8, %v1483_v61, 0.0 }
 0x7dd   : > { %1488 = vadd.xlane.f32.xlu1 %v1487_v62 }
 0x7df   : > { %v1480_v63 = vpop.f32.mrf.mxu2 }
 0x7e0   : > { %v1481_v0 = vadd.f32 %v2096_v58, %v1480_v63 }
 0x7e2   : > { %v1484_v1 = vadd.f32 %v1481_v0, %v1371_v27  ;;  %v2097_v27 = vld [vmem:[%s875_s2] ss:$0 sm:$0xff]  ;;  %s2911_s2 = sld [smem:[#allocation38_spill]] (!%p1935_p3) }
 0x7e4   : > { %v1490_v2 = vsel %vm978_vm8, %v1484_v1, 0.0 }
 0x7e5   : > { %1491 = vadd.xlane.f32.xlu0 %v1490_v2 }
 0x850   : > { %v1489_v3 = vpop.xlane.xlu1 %1488 }
 0x851   : > { %v1493_v4 = vmul.f32 %v1489_v3, %v2758_v51 }
 0x853   : > { %v1495_v5 = vsub.f32 %v1483_v61, %v1493_v4 }
 0x855   : > { %v1497_v6 = vmul.f32 %v1495_v5, %v1495_v5 }
 0x857   : > { %v1499_v7 = vsel %vm978_vm8, %v1497_v6, 0.0 }
 0x858   : > { %v1492_v8 = vpop.xlane.xlu0 %1491  ;;  %1500 = vadd.xlane.f32.xlu1 %v1499_v7 }
 0x859   : > { %v1494_v9 = vmul.f32 %v1492_v8, %v2758_v51 }
 0x85b   : > { %v1496_v10 = vsub.f32 %v1484_v1, %v1494_v9 }
 0x85d   : > { %v1498_v11 = vmul.f32 %v1496_v10, %v1496_v10 }
 0x85f   : > { %v1502_v12 = vsel %vm978_vm8, %v1498_v11, 0.0 }
 0x860   : > { %1503 = vadd.xlane.f32.xlu0 %v1502_v12 }
 0x8cb   : > { %v1501_v13 = vpop.xlane.xlu1 %1500 }
 0x8cc   : > { %v1505_v14 = vmul.f32 %v1501_v13, %v2758_v51 }
 0x8ce   : > { %v1507_v15 = vadd.f32 1e-12, %v1505_v14 }
 0x8d0   : > { %2125 = vrsqrt.f32 %v1507_v15  ;;  %vm1515_vm7 = vweird.f32 %v1507_v15 }
 0x8d3   : > { %v1504_v16 = vpop.xlane.xlu0 %1503 }
 0x8d4   : > { %v1506_v17 = vmul.f32 %v1504_v16, %v2758_v51 }
 0x8d6   : > { %v2126_v18 = vpop.eup %2125  ;;  %v1508_v19 = vadd.f32 1e-12, %v1506_v17 }
 0x8d7   : > { %v1510_v20 = vmul.f32 %v2126_v18, %v1507_v15  ;;  %vm1516_vm6 = vweird.f32 %v2126_v18 }
 0x8d8   : > { %2127 = vrsqrt.f32 %v1508_v19  ;;  %vm1517_vm9 = vmor %vm1515_vm7, %vm1516_vm6  ;;  %vm1525_vm11 = vweird.f32 %v1508_v19 }
 0x8d9   : > { %v1511_v21 = vmul.f32 %v2126_v18, %v1510_v20 }
 0x8db   : > { %v1512_v22 = vmul.f32 0.5, %v1511_v21 }
 0x8dd   : > { %v1513_v23 = vsub.f32 1.5, %v1512_v22 }
 0x8de   : > { %v2128_v24 = vpop.eup %2127 }
 0x8df   : > { %v1514_v25 = vmul.f32 %v2126_v18, %v1513_v23  ;;  %v1520_v26 = vmul.f32 %v2128_v24, %v1508_v19  ;;  %vm1526_vm10 = vweird.f32 %v2128_v24 }
 0x8e0   : > { %vm1527_vm12 = vmor %vm1525_vm11, %vm1526_vm10 }
 0x8e1   : > { %v1518_v51 = vsel %vm1517_vm9, %v2126_v18, %v1514_v25  ;;  %v1521_v28 = vmul.f32 %v2128_v24, %v1520_v26 }
 0x8e2   : > { %v1529_v30 = vmul.f32 %v1518_v51, %v1495_v5 }
 0x8e3   : > { %v1522_v31 = vmul.f32 0.5, %v1521_v28 }
 0x8e4   : > { %v1534_v32 = vmul.f32 %v2097_v27, %v1529_v30 }
 0x8e5   : > { %v1523_v33 = vsub.f32 1.5, %v1522_v31 }
 0x8e6   : > { %v1539_v34 = vadd.f32 %v2098_v29, %v1534_v32 }
 0x8e7   : > { %v1524_v35 = vmul.f32 %v2128_v24, %v1523_v33 }
 0x8e8   : > { %1541 = vst.msk [vmem:[#allocation2] sm:$0xff] %vm978_vm8, %v1539_v34 }
 0x8e9   : > { %v1528_v36 = vsel %vm1527_vm12, %v2128_v24, %v1524_v35 }
 0x8ea   : > { %v1530_v37 = vmul.f32 %v1528_v36, %v1496_v10 }
 0x8ec   : > { %v1535_v38 = vmul.f32 %v2097_v27, %v1530_v37  ;;  %1546 = sbr.rel (%p1935_p3) target bundleno = 2794 (0xaea), region = 124 }
 0x8ee   : > { %v1540_v39 = vadd.f32 %v2098_v29, %v1535_v38 }
 0x8f0   : > { %1542 = vst.msk [vmem:[#allocation2 + $0x8] sm:$0xff] %vm978_vm8, %v1540_v39 }
 0x8f1   : > { %v1965_v40 = vld [vmem:[#allocation12 + $0x8] sm:$0xff]  ;;  %v1964_v41 = vld [vmem:[#allocation12] sm:$0xff]  ;;  %v1547_v42 = vpack.c.bf16 %v1540_v39, %v1539_v34  ;;  %v2129_v43 = vld [vmem:[%s2911_s2] ss:$0 sm:$0xff]  ;;  %v1589_v48 = vlaneseq  ;;  %vm1623_vm0 = vcmask 7168  }
 0x8f2   : > { %1577 = vmatpush.bf16.msra.mxu0 %v1965_v40 }
 0x8f3   : > { %v1590_v49 = vand.u32 127, %v1589_v48 }
 0x8f6   : > { %1578 = vmatpush.bf16.msra.mxu0 %v1964_v41 }
 0x8f9   : > { %1944 = vmatmul.msk.bf16.vlgmr.msra.gmra.mxu0 %vm978_vm8, %v1547_v42 }
 0x976   : > { %v1580_v44 = vpop.f32.mrf.mxu0 }
 0x977   : > { %v1581_v45 = vadd.f32 %v2129_v43, %v1580_v44 }
 0x979   : > { %1585 = vmax.xlane.f32.xlu0 %v1581_v45 }
 0x97e   : > { %v1582_v46 = vpop.f32.mrf.mxu0 }
 0x97f   : > { %v1583_v47 = vadd.f32 %v2129_v43, %v1582_v46 }
 0x981   : > { %1587 = vmax.xlane.f32.xlu0 %v1583_v47 }
 0x9ec   : > { %v1586_v50 = vpop.xlane.xlu0 %1585 }
 0x9ed   : > { %vm1591_vm13 = vcmp.eq.f32.partialorder %v1581_v45, %v1586_v50 }
 0x9ee   : > { %v1593_v53 = vsel %vm1591_vm13, %v1590_v49, 1073741824 }
 0x9ef   : > { %v1596_v54 = vshra.s32 %v1593_v53, 16  ;;  %v1595_v59 = vand.u32 65535, %v1593_v53 }
 0x9f1   : > { %v1598_v55 = vcvt.s32.f32 %v1596_v54  ;;  %v1597_v61 = vcvt.s32.f32 %v1595_v59 }
 0x9f3   : > { %1599 = vmin.xlane.f32.xlu1 %v1598_v55 }
 0x9f4   : > { %v1588_v52 = vpop.xlane.xlu0 %1587 }
 0x9f5   : > { %vm1592_vm8 = vcmp.eq.f32.partialorder %v1583_v47, %v1588_v52 }
 0x9f6   : > { %v1594_v56 = vsel %vm1592_vm8, %v1590_v49, 1073741824 }
 0x9f7   : > { %v1610_v57 = vshra.s32 %v1594_v56, 16  ;;  %v1609_v63 = vand.u32 65535, %v1594_v56 }
 0x9f9   : > { %v1612_v58 = vcvt.s32.f32 %v1610_v57  ;;  %v1611_v1 = vcvt.s32.f32 %v1609_v63 }
 0x9fb   : > { %1613 = vmin.xlane.f32.xlu1 %v1612_v58 }
 0xa66   : > { %v1600_v60 = vpop.xlane.xlu1 %1599 }
 0xa67   : > { %vm1601_vm14 = vcmp.eq.f32.partialorder %v1598_v55, %v1600_v60  ;;  %v1606_v3 = vcvt.f32.s32 %v1600_v60 }
 0xa68   : > { %v1602_v62 = vsel %vm1601_vm14, %v1597_v61, inf }
 0xa69   : > { %1603 = vmin.xlane.f32.xlu2 %v1602_v62  ;;  %v1607_v5 = vshll.u32 %v1606_v3, 16 }
 0xa6e   : > { %v1614_v0 = vpop.xlane.xlu1 %1613 }
 0xa6f   : > { %vm1615_vm15 = vcmp.eq.f32.partialorder %v1612_v58, %v1614_v0  ;;  %v1620_v8 = vcvt.f32.s32 %v1614_v0 }
 0xa70   : > { %v1616_v2 = vsel %vm1615_vm15, %v1611_v1, inf }
 0xa71   : > { %1617 = vmin.xlane.f32.xlu2 %v1616_v2  ;;  %v1621_v10 = vshll.u32 %v1620_v8, 16 }
 0xadc   : > { %v1604_v4 = vpop.xlane.xlu2 %1603 }
 0xadd   : > { %v1605_v6 = vcvt.f32.s32 %v1604_v4 }
 0xadf   : > { %v1608_v7 = vadd.s32 %v1607_v5, %v1605_v6 }
 0xae1   : > { %1624 = vst.msk [vmem:[%s2912_s11] sm:$0xff] %vm1623_vm0, %v1608_v7 }
 0xae4   : > { %v1618_v9 = vpop.xlane.xlu2 %1617 }
 0xae5   : > { %v1619_v11 = vcvt.f32.s32 %v1618_v9 }
 0xae7   : > { %v1622_v12 = vadd.s32 %v1621_v10, %v1619_v11 }
 0xae9   : > { %1625 = vst.msk [vmem:[%s2912_s11 + $0x8] sm:$0xff] %vm1623_vm0, %v1622_v12 }
 0xaea PF: > { %s34_s19 = sadd.s32 1, %s2372_s19   ;;  %s2913_s27 = sld [smem:[#allocation18_spill]] }
 0xaeb   : > { %p31_p4 = scmp.ge.s32.totalorder %s34_s19, 4   ;;  %s2914_s28 = sld [smem:[#allocation19_spill]] }
 0xaec   : > { %s2915_s29 = sld [smem:[#allocation22_spill]] }
 0xaed   : > { %s2916_s30 = sld [smem:[#allocation20_spill]]  ;;  %33 = sbr.rel (!%p31_p4) target bundleno = 25 (0x19), region = 200 }
 0xaee   : > { %s2917_s0 = sld [smem:[#allocation21_spill]] }
 0xaf2   :  { %1648 = vsyncpa [#allocation5], 1 }
 0xaf3   :  { %1650 = vsyncpa [#allocation5 + $0x1], 1 }
 0xaf4   :  { %1651 = vsyncpa [#allocation7], 1 }
 0xaf5   :  { %1652 = vsyncpa [#allocation10], 1 }
 0xaf6   :  { %1654 = vsyncpa [#allocation10 + $0x1], 1 }
 0xaf7   :  { %1655 = vsyncpa [#allocation13], 1 }

</bundles_post_ra>
